<compile_context>
chip_gen: v7x
topology: tpu7x:2x2x1
jax: 0.10.0
libtpu: 0.0.40
codegen_flags: <defaults>
</compile_context>

<pallas_src>
import jax
import jax.numpy as jnp
from jax import lax
from jax.experimental import pallas as pl
from jax.experimental.pallas import tpu as pltpu

PAD_INDEX = 0
START_INDEX = 1
END_INDEX = 2

_VMEM_LIMIT_BYTES = 48 * 1024 * 1024  # explicit scoped-VMEM budget (fits v5e/v6e/v7x)


def _round_up(x, m):
    return ((x + m - 1) // m) * m


# ---------------------------------------------------------------------------
# Stage 1: teacher-forced GRU recurrence (input projections hoisted, fused
# hidden-to-hidden gate matmul on the critical path).
# ---------------------------------------------------------------------------
def gru_recurrence_kernel(emb_ref, h0_ref, wih_ref, whh_ref, bgi_ref, bhn_ref,
                          hs_ref, gi_scr):
    T, Bb, E = emb_ref.shape
    H = h0_ref.shape[-1]

    # Hoisted input projection: one big (T*Bb, E) @ (E, 3H) matmul, biases
    # (b_ih, plus b_hh for the r/z gates) pre-folded in.  Gate column order
    # is [r | z | n]; H is a multiple of 128 so slices stay lane-aligned.
    gi = jnp.dot(emb_ref[...].reshape(T * Bb, E), wih_ref[...],
                 preferred_element_type=jnp.float32) + bgi_ref[...]
    gi_scr[...] = gi.reshape(T, Bb, 3 * H)

    whh = whh_ref[...]                                   # (H, 3H) bf16
    bhn = jnp.broadcast_to(bhn_ref[...], (Bb, H))        # broadcast hoisted

    def step(t, h):
        gi_t = gi_scr[t]                                 # (Bb, 3H) f32
        hb = h.astype(jnp.bfloat16)
        # single fused hidden-to-hidden matmul on the serial chain
        gh = jnp.dot(hb, whh, preferred_element_type=jnp.float32)  # (Bb, 3H)
        r = jax.nn.sigmoid(gi_t[:, 0:H] + gh[:, 0:H])
        z = jax.nn.sigmoid(gi_t[:, H:2 * H] + gh[:, H:2 * H])
        n = jnp.tanh(gi_t[:, 2 * H:3 * H] + r * (gh[:, 2 * H:3 * H] + bhn))
        h_new = (1.0 - z) * n + z * h                    # f32 carry
        hs_ref[t] = h_new.astype(hs_ref.dtype)           # bf16 writeback
        return h_new

    unroll = True if T <= 32 else 8                      # LLO visibility
    lax.fori_loop(0, T, step, h0_ref[...], unroll=unroll)


def _run_gru_recurrence(emb_tm, h0, W_ih_cat, W_hh_cat, b_gi, b_hn, b_block):
    T, B_pad, E = emb_tm.shape
    H = h0.shape[-1]
    n_bb = B_pad // b_block

    grid_spec = pltpu.PrefetchScalarGridSpec(
        num_scalar_prefetch=0,
        grid=(n_bb,),
        in_specs=[
            pl.BlockSpec((T, b_block, E), lambda i: (0, i, 0)),   # embeddings
            pl.BlockSpec((b_block, H), lambda i: (i, 0)),         # h0
            pl.BlockSpec((E, 3 * H), lambda i: (0, 0)),           # W_ih (fused)
            pl.BlockSpec((H, 3 * H), lambda i: (0, 0)),           # W_hh (fused)
            pl.BlockSpec((1, 3 * H), lambda i: (0, 0)),           # folded gi bias
            pl.BlockSpec((1, H), lambda i: (0, 0)),               # b_hh[n]
        ],
        out_specs=pl.BlockSpec((T, b_block, H), lambda i: (0, i, 0)),
        scratch_shapes=[pltpu.VMEM((T, b_block, 3 * H), jnp.float32)],
    )
    return pl.pallas_call(
        gru_recurrence_kernel,
        out_shape=jax.ShapeDtypeStruct((T, B_pad, H), jnp.bfloat16),
        grid_spec=grid_spec,
        compiler_params=pltpu.CompilerParams(
            dimension_semantics=("parallel",),
            vmem_limit_bytes=_VMEM_LIMIT_BYTES),
    )(emb_tm, h0, W_ih_cat, W_hh_cat, b_gi, b_hn)


# ---------------------------------------------------------------------------
# Stage 2: vocab projection + online log-sum-exp + NLL (no one-hot stream).
# Vocab axis MUST stay the innermost ("arbitrary") grid axis: the m/s/g
# scratch accumulators assume a full vocab sweep per row tile.
# ---------------------------------------------------------------------------
def _make_vocab_proj_nll_kernel(return_logits):
    def kernel(hs_ref, wout_ref, bout_ref, gold_ref, *rest):
        if return_logits:
            logits_ref, nll_ref, m_scr, s_scr, g_scr = rest
        else:
            nll_ref, m_scr, s_scr, g_scr = rest
        j = pl.program_id(1)

        @pl.when(j == 0)
        def _():
            m_scr[...] = jnp.full_like(m_scr, -jnp.inf)
            s_scr[...] = jnp.zeros_like(s_scr)
            g_scr[...] = jnp.zeros_like(g_scr)

        logits = (jnp.dot(hs_ref[...], wout_ref[...],
                          preferred_element_type=jnp.float32) + bout_ref[...])
        if return_logits:
            logits_ref[...] = logits.astype(logits_ref.dtype)

        # online log-sum-exp across vocab tiles (pad columns carry a finite
        # -1e30 bias, so they contribute exp(very negative) = 0, never NaN)
        m_new = jnp.maximum(m_scr[...], jnp.max(logits, axis=-1, keepdims=True))
        scale = jnp.exp(m_scr[...] - m_new)
        s_scr[...] = s_scr[...] * scale + jnp.sum(jnp.exp(logits - m_new),
                                                  axis=-1, keepdims=True)
        m_scr[...] = m_new

        # gold-token logit via iota match (gold ids are always < real V,
        # so pad columns never match)
        tile_v = logits.shape[-1]
        col = j * tile_v + lax.broadcasted_iota(jnp.int32, logits.shape, 1)
        match = col == gold_ref[...]
        g_scr[...] += jnp.sum(jnp.where(match, logits, 0.0), axis=-1,
                              keepdims=True)

        @pl.when(j == pl.num_programs(1) - 1)
        def _():
            nll_ref[...] = (m_scr[...] + jnp.log(s_scr[...])) - g_scr[...]

    return kernel


def _run_vocab_proj_nll(hs_flat, W_out_p, b_out_p, gold_flat, row_tile, tile_v,
                        return_logits, logits_dtype=jnp.bfloat16):
    R_pad, H = hs_flat.shape
    V_pad = W_out_p.shape[-1]
    grid = (R_pad // row_tile, V_pad // tile_v)

    out_specs = []
    out_shapes = []
    if return_logits:
        out_specs.append(pl.BlockSpec((row_tile, tile_v), lambda i, j: (i, j)))
        out_shapes.append(jax.ShapeDtypeStruct((R_pad, V_pad), logits_dtype))
    out_specs.append(pl.BlockSpec((row_tile, 1), lambda i, j: (i, 0)))
    out_shapes.append(jax.ShapeDtypeStruct((R_pad, 1), jnp.float32))

    grid_spec = pltpu.PrefetchScalarGridSpec(
        num_scalar_prefetch=0,
        grid=grid,
        in_specs=[
            pl.BlockSpec((row_tile, H), lambda i, j: (i, 0)),     # hidden states
            pl.BlockSpec((H, tile_v), lambda i, j: (0, j)),       # W_out (V-tiled)
            pl.BlockSpec((1, tile_v), lambda i, j: (0, j)),       # b_out
            pl.BlockSpec((row_tile, 1), lambda i, j: (i, 0)),     # gold ids
        ],
        out_specs=out_specs,
        scratch_shapes=[pltpu.VMEM((row_tile, 1), jnp.float32)] * 3,
    )
    outs = pl.pallas_call(
        _make_vocab_proj_nll_kernel(return_logits),
        out_shape=tuple(out_shapes),
        grid_spec=grid_spec,
        compiler_params=pltpu.CompilerParams(
            dimension_semantics=("parallel", "arbitrary"),
            vmem_limit_bytes=_VMEM_LIMIT_BYTES),
    )(hs_flat, W_out_p, b_out_p, gold_flat)
    if return_logits:
        return outs[0], outs[1]
    return None, outs[0]


# ---------------------------------------------------------------------------
# Wrapper (plain-JAX glue: embedding gather, gate-fusion layout, padding,
# transposes, masking).
# ---------------------------------------------------------------------------
def decoder_forward(params, encoder_outs, target_tokens, pad_index=PAD_INDEX,
                    return_logits=True, logits_dtype=jnp.bfloat16):
    tokens = target_tokens["tokens"]                          # (B, T_total) int
    h0 = encoder_outs["encoder_final"].astype(jnp.float32)    # (B, H)

    emb_table = params["embedding"].astype(jnp.bfloat16)      # (V, E)
    W_ih = params["W_ih"].astype(jnp.bfloat16)                # (3, E, H) (r,z,n)
    W_hh = params["W_hh"].astype(jnp.bfloat16)                # (3, H, H)
    b_ih = params["b_ih"].astype(jnp.float32)                 # (3, 1, H)
    b_hh = params["b_hh"].astype(jnp.float32)                 # (3, 1, H)
    W_out = params["W_out"].astype(jnp.bfloat16)              # (H, V)
    b_out = params["b_out"].astype(jnp.float32)               # (1, V)

    V, E = emb_table.shape
    H = h0.shape[-1]

    # Fused gate layouts, column order [r | z | n].
    W_ih_cat = jnp.transpose(W_ih, (1, 0, 2)).reshape(E, 3 * H)
    W_hh_cat = jnp.transpose(W_hh, (1, 0, 2)).reshape(H, 3 * H)
    # b_ih (+ b_hh for r,z) folds into the hoisted input projection; b_hh[n]
    # must stay inside the r*(...) term so it is kept separate.
    b_gi = jnp.concatenate([b_ih[0] + b_hh[0], b_ih[1] + b_hh[1], b_ih[2]],
                           axis=1)                            # (1, 3H)
    b_hn = b_hh[2]                                            # (1, H)

    # teacher forcing: inputs = tokens[:, :-1], gold = tokens[:, 1:]
    dec_in = tokens[:, :-1]
    gold = tokens[:, 1:]
    B, T = dec_in.shape

    # batch block: sublane-aligned, capped so it stays VMEM/MXU friendly
    b_block = min(_round_up(max(B, 8), 8), 128)
    B_pad = _round_up(max(B, 8), b_block)
    pad_b = B_pad - B

    emb = jnp.take(emb_table, dec_in, axis=0)                 # (B, T, E) bf16
    emb_tm = jnp.transpose(emb, (1, 0, 2))                    # (T, B, E)
    emb_tm = jnp.pad(emb_tm, ((0, 0), (0, pad_b), (0, 0)))
    h0_p = jnp.pad(h0, ((0, pad_b), (0, 0)))

    # Stage 1: recurrence -> (T, B_pad, H) bf16 hidden states
    hs = _run_gru_recurrence(emb_tm, h0_p, W_ih_cat, W_hh_cat, b_gi, b_hn,
                             b_block)

    # Stage 2 tiling: fold (T, B_pad) into rows; always tile (and pad) vocab.
    R = T * B_pad
    row_tile = 256 if R >= 256 else _round_up(R, 8)
    R_pad = _round_up(R, row_tile)
    tile_v = 512
    V_pad = _round_up(V, tile_v)

    W_out_p = jnp.pad(W_out, ((0, 0), (0, V_pad - V)))
    # pad columns: finite large-negative bias (never -inf) so they drop out of
    # the LSE without risking exp(-inf - -inf) = NaN
    b_out_p = jnp.pad(b_out, ((0, 0), (0, V_pad - V)), constant_values=-1e30)

    hs_flat = jnp.pad(hs.reshape(R, H), ((0, R_pad - R), (0, 0)))

    gold_tm = jnp.transpose(gold, (1, 0))                     # (T, B)
    gold_tm_p = jnp.pad(gold_tm, ((0, 0), (0, pad_b)),
                        constant_values=pad_index)
    gold_flat = gold_tm_p.reshape(R, 1).astype(jnp.int32)
    gold_flat = jnp.pad(gold_flat, ((0, R_pad - R), (0, 0)),
                        constant_values=pad_index)

    # Stage 2: projection + LSE + per-row NLL (logits writeback optional)
    logits_flat, nll_row = _run_vocab_proj_nll(
        hs_flat, W_out_p, b_out_p, gold_flat, row_tile, tile_v,
        return_logits=return_logits, logits_dtype=logits_dtype)

    mask_tm = (gold_tm != pad_index).astype(jnp.float32)      # (T, B)
    mask_tm_p = jnp.pad(mask_tm, ((0, 0), (0, pad_b)))
    mask_flat = jnp.pad(mask_tm_p.reshape(R), (0, R_pad - R))

    nll_sum = jnp.sum(nll_row[:, 0] * mask_flat)
    num_tokens = jnp.maximum(jnp.sum(mask_flat), 1.0)
    loss = nll_sum / num_tokens

    out = {"loss": loss, "nll_sum": nll_sum}
    if return_logits:
        logits = logits_flat[:R].reshape(T, B_pad, V_pad)[:, :B, :V]
        out["logits"] = jnp.transpose(logits, (1, 0, 2))      # (B, T, V)
    return out


# ---------------------------------------------------------------------------
# Pure-JAX reference (mirrors the kernel's bf16 casts) for a sanity check.
# ---------------------------------------------------------------------------
def _reference_forward(params, encoder_outs, target_tokens, pad_index=PAD_INDEX):
    tokens = target_tokens["tokens"]
    h = encoder_outs["encoder_final"].astype(jnp.float32)
    f = lambda a: a.astype(jnp.bfloat16).astype(jnp.float32)
    emb_table, W_ih, W_hh = f(params["embedding"]), f(params["W_ih"]), f(params["W_hh"])
    W_out = f(params["W_out"])
    b_ih, b_hh = params["b_ih"].astype(jnp.float32), params["b_hh"].astype(jnp.float32)
    b_out = params["b_out"].astype(jnp.float32)

    dec_in, gold = tokens[:, :-1], tokens[:, 1:]
    B, T = dec_in.shape
    x_all = jnp.take(emb_table, dec_in, axis=0)
    hs = []
    for t in range(T):
        x = x_all[:, t]
        hb = h.astype(jnp.bfloat16).astype(jnp.float32)
        r = jax.nn.sigmoid(x @ W_ih[0] + b_ih[0] + hb @ W_hh[0] + b_hh[0])
        z = jax.nn.sigmoid(x @ W_ih[1] + b_ih[1] + hb @ W_hh[1] + b_hh[1])
        n = jnp.tanh(x @ W_ih[2] + b_ih[2] + r * (hb @ W_hh[2] + b_hh[2]))
        h = (1.0 - z) * n + z * h
        hs.append(h)
    hs = jnp.stack(hs, axis=1)                                # (B, T, H)
    hs_b = hs.astype(jnp.bfloat16).astype(jnp.float32)
    logits = hs_b @ W_out + b_out                             # (B, T, V)
    logp = jax.nn.log_softmax(logits, axis=-1)
    gold_lp = jnp.take_along_axis(logp, gold[..., None], axis=-1)[..., 0]
    mask = (gold != pad_index).astype(jnp.float32)
    nll_sum = -jnp.sum(gold_lp * mask)
    loss = nll_sum / jnp.maximum(jnp.sum(mask), 1.0)
    return {"logits": logits, "loss": loss, "nll_sum": nll_sum}


def init_params(key, vocab_size, embed_dim, hidden_dim):
    ks = jax.random.split(key, 7)
    s = 0.1
    return {
        "embedding": s * jax.random.normal(ks[0], (vocab_size, embed_dim), jnp.float32),
        "W_ih": s * jax.random.normal(ks[1], (3, embed_dim, hidden_dim), jnp.float32),
        "W_hh": s * jax.random.normal(ks[2], (3, hidden_dim, hidden_dim), jnp.float32),
        "b_ih": s * jax.random.normal(ks[3], (3, 1, hidden_dim), jnp.float32),
        "b_hh": s * jax.random.normal(ks[4], (3, 1, hidden_dim), jnp.float32),
        "W_out": s * jax.random.normal(ks[5], (hidden_dim, vocab_size), jnp.float32),
        "b_out": s * jax.random.normal(ks[6], (1, vocab_size), jnp.float32),
    }


if __name__ == "__main__":
    B, T_TOTAL = 2, 9           # -> T = 8 decoding steps
    H, E, V = 128, 128, 1000    # lane-aligned H/E; V NOT a tile multiple, so
                                # the vocab-padding + multi-tile LSE path runs

    key = jax.random.PRNGKey(0)
    k_tok, k_h0, k_par = jax.random.split(key, 3)

    tokens = jax.random.randint(k_tok, (B, T_TOTAL), 3, V, dtype=jnp.int32)
    tokens = tokens.at[:, 0].set(START_INDEX)
    tokens = tokens.at[0, -1].set(END_INDEX)
    tokens = tokens.at[1, -2].set(END_INDEX)
    tokens = tokens.at[1, -1].set(PAD_INDEX)

    encoder_outs = {"encoder_final": 0.1 * jax.random.normal(k_h0, (B, H), jnp.float32)}
    target_tokens = {"tokens": tokens}
    params = init_params(k_par, V, E, H)

    out = decoder_forward(params, encoder_outs, target_tokens)
    jax.block_until_ready(out["logits"])
    jax.block_until_ready(out["loss"])
    assert out["logits"].shape == (B, T_TOTAL - 1, V)
    assert bool(jnp.isfinite(out["loss"]))

    ref = _reference_forward(params, encoder_outs, target_tokens)
    assert jnp.allclose(out["logits"].astype(jnp.float32), ref["logits"],
                        atol=5e-2, rtol=5e-2)
    assert jnp.allclose(out["loss"], ref["loss"], atol=5e-2, rtol=5e-2)

    # loss-only training mode (skips the (R, V) logits HBM writeback)
    out_lo = decoder_forward(params, encoder_outs, target_tokens,
                             return_logits=False)
    jax.block_until_ready(out_lo["loss"])
    assert "logits" not in out_lo
    assert jnp.allclose(out_lo["loss"], ref["loss"], atol=5e-2, rtol=5e-2)

    print("KERNEL_OK")
</pallas_src>

<mosaic_0001>
module attributes {stable_mosaic.version = 11 : i64} {
  func.func @gru_recurrence_kernel(%arg0: i32, %arg1: memref<8x8x128xbf16, #tpu.memory_space<vmem>>, %arg2: memref<8x128xf32, #tpu.memory_space<vmem>>, %arg3: memref<128x384xbf16, #tpu.memory_space<vmem>>, %arg4: memref<128x384xbf16, #tpu.memory_space<vmem>>, %arg5: memref<1x384xf32, #tpu.memory_space<vmem>>, %arg6: memref<1x128xf32, #tpu.memory_space<vmem>>, %arg7: memref<8x8x128xbf16, #tpu.memory_space<vmem>>, %arg8: memref<8x8x384xf32, #tpu.memory_space<vmem>>) attributes {dimension_semantics = [#tpu.dimension_semantics<parallel>], iteration_bounds = array<i64: 1>, scalar_prefetch = 0 : i64, scratch_operands = 1 : i64, tpu.core_type = #tpu.core_type<tc>, window_params = [{transform_indices = @transform_0, window_bounds = array<i64: 8, 8, 128>}, {transform_indices = @transform_1, window_bounds = array<i64: 8, 128>}, {pipeline_mode = #tpu.pipeline_mode<synchronous>, transform_indices = @transform_2, window_bounds = array<i64: 128, 384>}, {pipeline_mode = #tpu.pipeline_mode<synchronous>, transform_indices = @transform_3, window_bounds = array<i64: 128, 384>}, {pipeline_mode = #tpu.pipeline_mode<synchronous>, transform_indices = @transform_4, window_bounds = array<i64: 1, 384>}, {pipeline_mode = #tpu.pipeline_mode<synchronous>, transform_indices = @transform_5, window_bounds = array<i64: 1, 128>}, {transform_indices = @transform_6, window_bounds = array<i64: 8, 8, 128>}]} {
    %c0 = arith.constant 0 : index
    %c0_0 = arith.constant 0 : index
    %c0_1 = arith.constant 0 : index
    %0 = vector.load %arg1[%c0, %c0_0, %c0_1] : memref<8x8x128xbf16, #tpu.memory_space<vmem>>, vector<8x8x128xbf16>
    %1 = vector.shape_cast %0 : vector<8x8x128xbf16> to vector<64x128xbf16>
    %c0_2 = arith.constant 0 : index
    %c0_3 = arith.constant 0 : index
    %2 = vector.load %arg3[%c0_2, %c0_3] : memref<128x384xbf16, #tpu.memory_space<vmem>>, vector<128x384xbf16>
    %cst = arith.constant dense<0.000000e+00> : vector<64x384xf32>
    %3 = tpu.matmul %1, %2, %cst {dimension_numbers = #tpu.dot_dimension_numbers<[1], [0], [0], [1], [0, 0, 1, 1], [], []>} : vector<64x128xbf16>, vector<128x384xbf16>, vector<64x384xf32> -> vector<64x384xf32>
    %c0_4 = arith.constant 0 : index
    %c0_5 = arith.constant 0 : index
    %4 = vector.load %arg5[%c0_4, %c0_5] : memref<1x384xf32, #tpu.memory_space<vmem>>, vector<1x384xf32>
    %5 = vector.broadcast %4 : vector<1x384xf32> to vector<64x384xf32>
    %6 = arith.addf %3, %5 : vector<64x384xf32>
    %7 = vector.shape_cast %6 : vector<64x384xf32> to vector<8x8x384xf32>
    %c0_6 = arith.constant 0 : index
    %c0_7 = arith.constant 0 : index
    %c0_8 = arith.constant 0 : index
    %8 = vector.load %arg8[%c0_6, %c0_7, %c0_8] : memref<8x8x384xf32, #tpu.memory_space<vmem>>, vector<8x8x384xf32>
    tpu.vector_store %arg8[%c0_6, %c0_7, %c0_8], %7 {strides = array<i32>} : memref<8x8x384xf32, #tpu.memory_space<vmem>>, vector<8x8x384xf32>,
    %c0_9 = arith.constant 0 : index
    %c0_10 = arith.constant 0 : index
    %9 = vector.load %arg4[%c0_9, %c0_10] : memref<128x384xbf16, #tpu.memory_space<vmem>>, vector<128x384xbf16>
    %c0_11 = arith.constant 0 : index
    %c0_12 = arith.constant 0 : index
    %10 = vector.load %arg6[%c0_11, %c0_12] : memref<1x128xf32, #tpu.memory_space<vmem>>, vector<1x128xf32>
    %11 = vector.shape_cast %10 : vector<1x128xf32> to vector<1x128xf32>
    %12 = vector.broadcast %11 : vector<1x128xf32> to vector<8x128xf32>
    %c0_13 = arith.constant 0 : index
    %c0_14 = arith.constant 0 : index
    %13 = vector.load %arg2[%c0_13, %c0_14] : memref<8x128xf32, #tpu.memory_space<vmem>>, vector<8x128xf32>
    %c0_i32 = arith.constant 0 : i32
    %14 = arith.index_cast %c0_i32 : i32 to index
    %c0_15 = arith.constant 0 : index
    %c0_16 = arith.constant 0 : index
    %15 = vector.load %arg8[%14, %c0_15, %c0_16] : memref<8x8x384xf32, #tpu.memory_space<vmem>>, vector<1x8x384xf32>
    %16 = vector.shape_cast %15 : vector<1x8x384xf32> to vector<8x384xf32>
    %17 = arith.truncf %13 : vector<8x128xf32> to vector<8x128xbf16>
    %cst_17 = arith.constant dense<0.000000e+00> : vector<8x384xf32>
    %18 = tpu.matmul %17, %9, %cst_17 {dimension_numbers = #tpu.dot_dimension_numbers<[1], [0], [0], [1], [0, 0, 1, 1], [], []>} : vector<8x128xbf16>, vector<128x384xbf16>, vector<8x384xf32> -> vector<8x384xf32>
    %19 = vector.extract_strided_slice %16 {offsets = [0, 0], sizes = [8, 128], strides = [1, 1]} : vector<8x384xf32> to vector<8x128xf32>
    %20 = vector.extract_strided_slice %18 {offsets = [0, 0], sizes = [8, 128], strides = [1, 1]} : vector<8x384xf32> to vector<8x128xf32>
    %21 = arith.addf %19, %20 : vector<8x128xf32>
    %22 = arith.negf %21 : vector<8x128xf32>
    %23 = math.exp %22 : vector<8x128xf32>
    %cst_18 = arith.constant 1.000000e+00 : f32
    %24 = vector.broadcast %cst_18 : f32 to vector<8x128xf32>
    %25 = arith.addf %24, %23 : vector<8x128xf32>
    %26 = arith.divf %24, %25 : vector<8x128xf32>
    %27 = vector.extract_strided_slice %16 {offsets = [0, 128], sizes = [8, 128], strides = [1, 1]} : vector<8x384xf32> to vector<8x128xf32>
    %28 = vector.extract_strided_slice %18 {offsets = [0, 128], sizes = [8, 128], strides = [1, 1]} : vector<8x384xf32> to vector<8x128xf32>
    %29 = arith.addf %27, %28 : vector<8x128xf32>
    %30 = arith.negf %29 : vector<8x128xf32>
    %31 = math.exp %30 : vector<8x128xf32>
    %cst_19 = arith.constant 1.000000e+00 : f32
    %32 = vector.broadcast %cst_19 : f32 to vector<8x128xf32>
    %33 = arith.addf %32, %31 : vector<8x128xf32>
    %34 = arith.divf %32, %33 : vector<8x128xf32>
    %35 = vector.extract_strided_slice %16 {offsets = [0, 256], sizes = [8, 128], strides = [1, 1]} : vector<8x384xf32> to vector<8x128xf32>
    %36 = vector.extract_strided_slice %18 {offsets = [0, 256], sizes = [8, 128], strides = [1, 1]} : vector<8x384xf32> to vector<8x128xf32>
    %37 = arith.addf %36, %12 : vector<8x128xf32>
    %38 = arith.mulf %26, %37 : vector<8x128xf32>
    %39 = arith.addf %35, %38 : vector<8x128xf32>
    %40 = math.tanh %39 : vector<8x128xf32>
    %cst_20 = arith.constant 1.000000e+00 : f32
    %41 = vector.broadcast %cst_20 : f32 to vector<8x128xf32>
    %42 = arith.subf %41, %34 : vector<8x128xf32>
    %43 = arith.mulf %42, %40 : vector<8x128xf32>
    %44 = arith.mulf %34, %13 : vector<8x128xf32>
    %45 = arith.addf %43, %44 : vector<8x128xf32>
    %46 = arith.truncf %45 : vector<8x128xf32> to vector<8x128xbf16>
    %47 = arith.index_cast %c0_i32 : i32 to index
    %c0_21 = arith.constant 0 : index
    %c0_22 = arith.constant 0 : index
    %48 = vector.load %arg7[%47, %c0_21, %c0_22] : memref<8x8x128xbf16, #tpu.memory_space<vmem>>, vector<1x8x128xbf16>
    %49 = vector.shape_cast %48 : vector<1x8x128xbf16> to vector<8x128xbf16>
    %50 = vector.shape_cast %46 : vector<8x128xbf16> to vector<1x8x128xbf16>
    tpu.vector_store %arg7[%47, %c0_21, %c0_22], %50 {strides = array<i32>} : memref<8x8x128xbf16, #tpu.memory_space<vmem>>, vector<1x8x128xbf16>,
    %c1_i32 = arith.constant 1 : i32
    %51 = arith.index_cast %c1_i32 : i32 to index
    %c0_23 = arith.constant 0 : index
    %c0_24 = arith.constant 0 : index
    %52 = vector.load %arg8[%51, %c0_23, %c0_24] : memref<8x8x384xf32, #tpu.memory_space<vmem>>, vector<1x8x384xf32>
    %53 = vector.shape_cast %52 : vector<1x8x384xf32> to vector<8x384xf32>
    %54 = arith.truncf %45 : vector<8x128xf32> to vector<8x128xbf16>
    %cst_25 = arith.constant dense<0.000000e+00> : vector<8x384xf32>
    %55 = tpu.matmul %54, %9, %cst_25 {dimension_numbers = #tpu.dot_dimension_numbers<[1], [0], [0], [1], [0, 0, 1, 1], [], []>} : vector<8x128xbf16>, vector<128x384xbf16>, vector<8x384xf32> -> vector<8x384xf32>
    %56 = vector.extract_strided_slice %53 {offsets = [0, 0], sizes = [8, 128], strides = [1, 1]} : vector<8x384xf32> to vector<8x128xf32>
    %57 = vector.extract_strided_slice %55 {offsets = [0, 0], sizes = [8, 128], strides = [1, 1]} : vector<8x384xf32> to vector<8x128xf32>
    %58 = arith.addf %56, %57 : vector<8x128xf32>
    %59 = arith.negf %58 : vector<8x128xf32>
    %60 = math.exp %59 : vector<8x128xf32>
    %cst_26 = arith.constant 1.000000e+00 : f32
    %61 = vector.broadcast %cst_26 : f32 to vector<8x128xf32>
    %62 = arith.addf %61, %60 : vector<8x128xf32>
    %63 = arith.divf %61, %62 : vector<8x128xf32>
    %64 = vector.extract_strided_slice %53 {offsets = [0, 128], sizes = [8, 128], strides = [1, 1]} : vector<8x384xf32> to vector<8x128xf32>
    %65 = vector.extract_strided_slice %55 {offsets = [0, 128], sizes = [8, 128], strides = [1, 1]} : vector<8x384xf32> to vector<8x128xf32>
    %66 = arith.addf %64, %65 : vector<8x128xf32>
    %67 = arith.negf %66 : vector<8x128xf32>
    %68 = math.exp %67 : vector<8x128xf32>
    %cst_27 = arith.constant 1.000000e+00 : f32
    %69 = vector.broadcast %cst_27 : f32 to vector<8x128xf32>
    %70 = arith.addf %69, %68 : vector<8x128xf32>
    %71 = arith.divf %69, %70 : vector<8x128xf32>
    %72 = vector.extract_strided_slice %53 {offsets = [0, 256], sizes = [8, 128], strides = [1, 1]} : vector<8x384xf32> to vector<8x128xf32>
    %73 = vector.extract_strided_slice %55 {offsets = [0, 256], sizes = [8, 128], strides = [1, 1]} : vector<8x384xf32> to vector<8x128xf32>
    %74 = arith.addf %73, %12 : vector<8x128xf32>
    %75 = arith.mulf %63, %74 : vector<8x128xf32>
    %76 = arith.addf %72, %75 : vector<8x128xf32>
    %77 = math.tanh %76 : vector<8x128xf32>
    %cst_28 = arith.constant 1.000000e+00 : f32
    %78 = vector.broadcast %cst_28 : f32 to vector<8x128xf32>
    %79 = arith.subf %78, %71 : vector<8x128xf32>
    %80 = arith.mulf %79, %77 : vector<8x128xf32>
    %81 = arith.mulf %71, %45 : vector<8x128xf32>
    %82 = arith.addf %80, %81 : vector<8x128xf32>
    %83 = arith.truncf %82 : vector<8x128xf32> to vector<8x128xbf16>
    %84 = arith.index_cast %c1_i32 : i32 to index
    %c0_29 = arith.constant 0 : index
    %c0_30 = arith.constant 0 : index
    %85 = vector.load %arg7[%84, %c0_29, %c0_30] : memref<8x8x128xbf16, #tpu.memory_space<vmem>>, vector<1x8x128xbf16>
    %86 = vector.shape_cast %85 : vector<1x8x128xbf16> to vector<8x128xbf16>
    %87 = vector.shape_cast %83 : vector<8x128xbf16> to vector<1x8x128xbf16>
    tpu.vector_store %arg7[%84, %c0_29, %c0_30], %87 {strides = array<i32>} : memref<8x8x128xbf16, #tpu.memory_space<vmem>>, vector<1x8x128xbf16>,
    %c2_i32 = arith.constant 2 : i32
    %88 = arith.index_cast %c2_i32 : i32 to index
    %c0_31 = arith.constant 0 : index
    %c0_32 = arith.constant 0 : index
    %89 = vector.load %arg8[%88, %c0_31, %c0_32] : memref<8x8x384xf32, #tpu.memory_space<vmem>>, vector<1x8x384xf32>
    %90 = vector.shape_cast %89 : vector<1x8x384xf32> to vector<8x384xf32>
    %91 = arith.truncf %82 : vector<8x128xf32> to vector<8x128xbf16>
    %cst_33 = arith.constant dense<0.000000e+00> : vector<8x384xf32>
    %92 = tpu.matmul %91, %9, %cst_33 {dimension_numbers = #tpu.dot_dimension_numbers<[1], [0], [0], [1], [0, 0, 1, 1], [], []>} : vector<8x128xbf16>, vector<128x384xbf16>, vector<8x384xf32> -> vector<8x384xf32>
    %93 = vector.extract_strided_slice %90 {offsets = [0, 0], sizes = [8, 128], strides = [1, 1]} : vector<8x384xf32> to vector<8x128xf32>
    %94 = vector.extract_strided_slice %92 {offsets = [0, 0], sizes = [8, 128], strides = [1, 1]} : vector<8x384xf32> to vector<8x128xf32>
    %95 = arith.addf %93, %94 : vector<8x128xf32>
    %96 = arith.negf %95 : vector<8x128xf32>
    %97 = math.exp %96 : vector<8x128xf32>
    %cst_34 = arith.constant 1.000000e+00 : f32
    %98 = vector.broadcast %cst_34 : f32 to vector<8x128xf32>
    %99 = arith.addf %98, %97 : vector<8x128xf32>
    %100 = arith.divf %98, %99 : vector<8x128xf32>
    %101 = vector.extract_strided_slice %90 {offsets = [0, 128], sizes = [8, 128], strides = [1, 1]} : vector<8x384xf32> to vector<8x128xf32>
    %102 = vector.extract_strided_slice %92 {offsets = [0, 128], sizes = [8, 128], strides = [1, 1]} : vector<8x384xf32> to vector<8x128xf32>
    %103 = arith.addf %101, %102 : vector<8x128xf32>
    %104 = arith.negf %103 : vector<8x128xf32>
    %105 = math.exp %104 : vector<8x128xf32>
    %cst_35 = arith.constant 1.000000e+00 : f32
    %106 = vector.broadcast %cst_35 : f32 to vector<8x128xf32>
    %107 = arith.addf %106, %105 : vector<8x128xf32>
    %108 = arith.divf %106, %107 : vector<8x128xf32>
    %109 = vector.extract_strided_slice %90 {offsets = [0, 256], sizes = [8, 128], strides = [1, 1]} : vector<8x384xf32> to vector<8x128xf32>
    %110 = vector.extract_strided_slice %92 {offsets = [0, 256], sizes = [8, 128], strides = [1, 1]} : vector<8x384xf32> to vector<8x128xf32>
    %111 = arith.addf %110, %12 : vector<8x128xf32>
    %112 = arith.mulf %100, %111 : vector<8x128xf32>
    %113 = arith.addf %109, %112 : vector<8x128xf32>
    %114 = math.tanh %113 : vector<8x128xf32>
    %cst_36 = arith.constant 1.000000e+00 : f32
    %115 = vector.broadcast %cst_36 : f32 to vector<8x128xf32>
    %116 = arith.subf %115, %108 : vector<8x128xf32>
    %117 = arith.mulf %116, %114 : vector<8x128xf32>
    %118 = arith.mulf %108, %82 : vector<8x128xf32>
    %119 = arith.addf %117, %118 : vector<8x128xf32>
    %120 = arith.truncf %119 : vector<8x128xf32> to vector<8x128xbf16>
    %121 = arith.index_cast %c2_i32 : i32 to index
    %c0_37 = arith.constant 0 : index
    %c0_38 = arith.constant 0 : index
    %122 = vector.load %arg7[%121, %c0_37, %c0_38] : memref<8x8x128xbf16, #tpu.memory_space<vmem>>, vector<1x8x128xbf16>
    %123 = vector.shape_cast %122 : vector<1x8x128xbf16> to vector<8x128xbf16>
    %124 = vector.shape_cast %120 : vector<8x128xbf16> to vector<1x8x128xbf16>
    tpu.vector_store %arg7[%121, %c0_37, %c0_38], %124 {strides = array<i32>} : memref<8x8x128xbf16, #tpu.memory_space<vmem>>, vector<1x8x128xbf16>,
    %c3_i32 = arith.constant 3 : i32
    %125 = arith.index_cast %c3_i32 : i32 to index
    %c0_39 = arith.constant 0 : index
    %c0_40 = arith.constant 0 : index
    %126 = vector.load %arg8[%125, %c0_39, %c0_40] : memref<8x8x384xf32, #tpu.memory_space<vmem>>, vector<1x8x384xf32>
    %127 = vector.shape_cast %126 : vector<1x8x384xf32> to vector<8x384xf32>
    %128 = arith.truncf %119 : vector<8x128xf32> to vector<8x128xbf16>
    %cst_41 = arith.constant dense<0.000000e+00> : vector<8x384xf32>
    %129 = tpu.matmul %128, %9, %cst_41 {dimension_numbers = #tpu.dot_dimension_numbers<[1], [0], [0], [1], [0, 0, 1, 1], [], []>} : vector<8x128xbf16>, vector<128x384xbf16>, vector<8x384xf32> -> vector<8x384xf32>
    %130 = vector.extract_strided_slice %127 {offsets = [0, 0], sizes = [8, 128], strides = [1, 1]} : vector<8x384xf32> to vector<8x128xf32>
    %131 = vector.extract_strided_slice %129 {offsets = [0, 0], sizes = [8, 128], strides = [1, 1]} : vector<8x384xf32> to vector<8x128xf32>
    %132 = arith.addf %130, %131 : vector<8x128xf32>
    %133 = arith.negf %132 : vector<8x128xf32>
    %134 = math.exp %133 : vector<8x128xf32>
    %cst_42 = arith.constant 1.000000e+00 : f32
    %135 = vector.broadcast %cst_42 : f32 to vector<8x128xf32>
    %136 = arith.addf %135, %134 : vector<8x128xf32>
    %137 = arith.divf %135, %136 : vector<8x128xf32>
    %138 = vector.extract_strided_slice %127 {offsets = [0, 128], sizes = [8, 128], strides = [1, 1]} : vector<8x384xf32> to vector<8x128xf32>
    %139 = vector.extract_strided_slice %129 {offsets = [0, 128], sizes = [8, 128], strides = [1, 1]} : vector<8x384xf32> to vector<8x128xf32>
    %140 = arith.addf %138, %139 : vector<8x128xf32>
    %141 = arith.negf %140 : vector<8x128xf32>
    %142 = math.exp %141 : vector<8x128xf32>
    %cst_43 = arith.constant 1.000000e+00 : f32
    %143 = vector.broadcast %cst_43 : f32 to vector<8x128xf32>
    %144 = arith.addf %143, %142 : vector<8x128xf32>
    %145 = arith.divf %143, %144 : vector<8x128xf32>
    %146 = vector.extract_strided_slice %127 {offsets = [0, 256], sizes = [8, 128], strides = [1, 1]} : vector<8x384xf32> to vector<8x128xf32>
    %147 = vector.extract_strided_slice %129 {offsets = [0, 256], sizes = [8, 128], strides = [1, 1]} : vector<8x384xf32> to vector<8x128xf32>
    %148 = arith.addf %147, %12 : vector<8x128xf32>
    %149 = arith.mulf %137, %148 : vector<8x128xf32>
    %150 = arith.addf %146, %149 : vector<8x128xf32>
    %151 = math.tanh %150 : vector<8x128xf32>
    %cst_44 = arith.constant 1.000000e+00 : f32
    %152 = vector.broadcast %cst_44 : f32 to vector<8x128xf32>
    %153 = arith.subf %152, %145 : vector<8x128xf32>
    %154 = arith.mulf %153, %151 : vector<8x128xf32>
    %155 = arith.mulf %145, %119 : vector<8x128xf32>
    %156 = arith.addf %154, %155 : vector<8x128xf32>
    %157 = arith.truncf %156 : vector<8x128xf32> to vector<8x128xbf16>
    %158 = arith.index_cast %c3_i32 : i32 to index
    %c0_45 = arith.constant 0 : index
    %c0_46 = arith.constant 0 : index
    %159 = vector.load %arg7[%158, %c0_45, %c0_46] : memref<8x8x128xbf16, #tpu.memory_space<vmem>>, vector<1x8x128xbf16>
    %160 = vector.shape_cast %159 : vector<1x8x128xbf16> to vector<8x128xbf16>
    %161 = vector.shape_cast %157 : vector<8x128xbf16> to vector<1x8x128xbf16>
    tpu.vector_store %arg7[%158, %c0_45, %c0_46], %161 {strides = array<i32>} : memref<8x8x128xbf16, #tpu.memory_space<vmem>>, vector<1x8x128xbf16>,
    %c4_i32 = arith.constant 4 : i32
    %162 = arith.index_cast %c4_i32 : i32 to index
    %c0_47 = arith.constant 0 : index
    %c0_48 = arith.constant 0 : index
    %163 = vector.load %arg8[%162, %c0_47, %c0_48] : memref<8x8x384xf32, #tpu.memory_space<vmem>>, vector<1x8x384xf32>
    %164 = vector.shape_cast %163 : vector<1x8x384xf32> to vector<8x384xf32>
    %165 = arith.truncf %156 : vector<8x128xf32> to vector<8x128xbf16>
    %cst_49 = arith.constant dense<0.000000e+00> : vector<8x384xf32>
    %166 = tpu.matmul %165, %9, %cst_49 {dimension_numbers = #tpu.dot_dimension_numbers<[1], [0], [0], [1], [0, 0, 1, 1], [], []>} : vector<8x128xbf16>, vector<128x384xbf16>, vector<8x384xf32> -> vector<8x384xf32>
    %167 = vector.extract_strided_slice %164 {offsets = [0, 0], sizes = [8, 128], strides = [1, 1]} : vector<8x384xf32> to vector<8x128xf32>
    %168 = vector.extract_strided_slice %166 {offsets = [0, 0], sizes = [8, 128], strides = [1, 1]} : vector<8x384xf32> to vector<8x128xf32>
    %169 = arith.addf %167, %168 : vector<8x128xf32>
    %170 = arith.negf %169 : vector<8x128xf32>
    %171 = math.exp %170 : vector<8x128xf32>
    %cst_50 = arith.constant 1.000000e+00 : f32
    %172 = vector.broadcast %cst_50 : f32 to vector<8x128xf32>
    %173 = arith.addf %172, %171 : vector<8x128xf32>
    %174 = arith.divf %172, %173 : vector<8x128xf32>
    %175 = vector.extract_strided_slice %164 {offsets = [0, 128], sizes = [8, 128], strides = [1, 1]} : vector<8x384xf32> to vector<8x128xf32>
    %176 = vector.extract_strided_slice %166 {offsets = [0, 128], sizes = [8, 128], strides = [1, 1]} : vector<8x384xf32> to vector<8x128xf32>
    %177 = arith.addf %175, %176 : vector<8x128xf32>
    %178 = arith.negf %177 : vector<8x128xf32>
    %179 = math.exp %178 : vector<8x128xf32>
    %cst_51 = arith.constant 1.000000e+00 : f32
    %180 = vector.broadcast %cst_51 : f32 to vector<8x128xf32>
    %181 = arith.addf %180, %179 : vector<8x128xf32>
    %182 = arith.divf %180, %181 : vector<8x128xf32>
    %183 = vector.extract_strided_slice %164 {offsets = [0, 256], sizes = [8, 128], strides = [1, 1]} : vector<8x384xf32> to vector<8x128xf32>
    %184 = vector.extract_strided_slice %166 {offsets = [0, 256], sizes = [8, 128], strides = [1, 1]} : vector<8x384xf32> to vector<8x128xf32>
    %185 = arith.addf %184, %12 : vector<8x128xf32>
    %186 = arith.mulf %174, %185 : vector<8x128xf32>
    %187 = arith.addf %183, %186 : vector<8x128xf32>
    %188 = math.tanh %187 : vector<8x128xf32>
    %cst_52 = arith.constant 1.000000e+00 : f32
    %189 = vector.broadcast %cst_52 : f32 to vector<8x128xf32>
    %190 = arith.subf %189, %182 : vector<8x128xf32>
    %191 = arith.mulf %190, %188 : vector<8x128xf32>
    %192 = arith.mulf %182, %156 : vector<8x128xf32>
    %193 = arith.addf %191, %192 : vector<8x128xf32>
    %194 = arith.truncf %193 : vector<8x128xf32> to vector<8x128xbf16>
    %195 = arith.index_cast %c4_i32 : i32 to index
    %c0_53 = arith.constant 0 : index
    %c0_54 = arith.constant 0 : index
    %196 = vector.load %arg7[%195, %c0_53, %c0_54] : memref<8x8x128xbf16, #tpu.memory_space<vmem>>, vector<1x8x128xbf16>
    %197 = vector.shape_cast %196 : vector<1x8x128xbf16> to vector<8x128xbf16>
    %198 = vector.shape_cast %194 : vector<8x128xbf16> to vector<1x8x128xbf16>
    tpu.vector_store %arg7[%195, %c0_53, %c0_54], %198 {strides = array<i32>} : memref<8x8x128xbf16, #tpu.memory_space<vmem>>, vector<1x8x128xbf16>,
    %c5_i32 = arith.constant 5 : i32
    %199 = arith.index_cast %c5_i32 : i32 to index
    %c0_55 = arith.constant 0 : index
    %c0_56 = arith.constant 0 : index
    %200 = vector.load %arg8[%199, %c0_55, %c0_56] : memref<8x8x384xf32, #tpu.memory_space<vmem>>, vector<1x8x384xf32>
    %201 = vector.shape_cast %200 : vector<1x8x384xf32> to vector<8x384xf32>
    %202 = arith.truncf %193 : vector<8x128xf32> to vector<8x128xbf16>
    %cst_57 = arith.constant dense<0.000000e+00> : vector<8x384xf32>
    %203 = tpu.matmul %202, %9, %cst_57 {dimension_numbers = #tpu.dot_dimension_numbers<[1], [0], [0], [1], [0, 0, 1, 1], [], []>} : vector<8x128xbf16>, vector<128x384xbf16>, vector<8x384xf32> -> vector<8x384xf32>
    %204 = vector.extract_strided_slice %201 {offsets = [0, 0], sizes = [8, 128], strides = [1, 1]} : vector<8x384xf32> to vector<8x128xf32>
    %205 = vector.extract_strided_slice %203 {offsets = [0, 0], sizes = [8, 128], strides = [1, 1]} : vector<8x384xf32> to vector<8x128xf32>
    %206 = arith.addf %204, %205 : vector<8x128xf32>
    %207 = arith.negf %206 : vector<8x128xf32>
    %208 = math.exp %207 : vector<8x128xf32>
    %cst_58 = arith.constant 1.000000e+00 : f32
    %209 = vector.broadcast %cst_58 : f32 to vector<8x128xf32>
    %210 = arith.addf %209, %208 : vector<8x128xf32>
    %211 = arith.divf %209, %210 : vector<8x128xf32>
    %212 = vector.extract_strided_slice %201 {offsets = [0, 128], sizes = [8, 128], strides = [1, 1]} : vector<8x384xf32> to vector<8x128xf32>
    %213 = vector.extract_strided_slice %203 {offsets = [0, 128], sizes = [8, 128], strides = [1, 1]} : vector<8x384xf32> to vector<8x128xf32>
    %214 = arith.addf %212, %213 : vector<8x128xf32>
    %215 = arith.negf %214 : vector<8x128xf32>
    %216 = math.exp %215 : vector<8x128xf32>
    %cst_59 = arith.constant 1.000000e+00 : f32
    %217 = vector.broadcast %cst_59 : f32 to vector<8x128xf32>
    %218 = arith.addf %217, %216 : vector<8x128xf32>
    %219 = arith.divf %217, %218 : vector<8x128xf32>
    %220 = vector.extract_strided_slice %201 {offsets = [0, 256], sizes = [8, 128], strides = [1, 1]} : vector<8x384xf32> to vector<8x128xf32>
    %221 = vector.extract_strided_slice %203 {offsets = [0, 256], sizes = [8, 128], strides = [1, 1]} : vector<8x384xf32> to vector<8x128xf32>
    %222 = arith.addf %221, %12 : vector<8x128xf32>
    %223 = arith.mulf %211, %222 : vector<8x128xf32>
    %224 = arith.addf %220, %223 : vector<8x128xf32>
    %225 = math.tanh %224 : vector<8x128xf32>
    %cst_60 = arith.constant 1.000000e+00 : f32
    %226 = vector.broadcast %cst_60 : f32 to vector<8x128xf32>
    %227 = arith.subf %226, %219 : vector<8x128xf32>
    %228 = arith.mulf %227, %225 : vector<8x128xf32>
    %229 = arith.mulf %219, %193 : vector<8x128xf32>
    %230 = arith.addf %228, %229 : vector<8x128xf32>
    %231 = arith.truncf %230 : vector<8x128xf32> to vector<8x128xbf16>
    %232 = arith.index_cast %c5_i32 : i32 to index
    %c0_61 = arith.constant 0 : index
    %c0_62 = arith.constant 0 : index
    %233 = vector.load %arg7[%232, %c0_61, %c0_62] : memref<8x8x128xbf16, #tpu.memory_space<vmem>>, vector<1x8x128xbf16>
    %234 = vector.shape_cast %233 : vector<1x8x128xbf16> to vector<8x128xbf16>
    %235 = vector.shape_cast %231 : vector<8x128xbf16> to vector<1x8x128xbf16>
    tpu.vector_store %arg7[%232, %c0_61, %c0_62], %235 {strides = array<i32>} : memref<8x8x128xbf16, #tpu.memory_space<vmem>>, vector<1x8x128xbf16>,
    %c6_i32 = arith.constant 6 : i32
    %236 = arith.index_cast %c6_i32 : i32 to index
    %c0_63 = arith.constant 0 : index
    %c0_64 = arith.constant 0 : index
    %237 = vector.load %arg8[%236, %c0_63, %c0_64] : memref<8x8x384xf32, #tpu.memory_space<vmem>>, vector<1x8x384xf32>
    %238 = vector.shape_cast %237 : vector<1x8x384xf32> to vector<8x384xf32>
    %239 = arith.truncf %230 : vector<8x128xf32> to vector<8x128xbf16>
    %cst_65 = arith.constant dense<0.000000e+00> : vector<8x384xf32>
    %240 = tpu.matmul %239, %9, %cst_65 {dimension_numbers = #tpu.dot_dimension_numbers<[1], [0], [0], [1], [0, 0, 1, 1], [], []>} : vector<8x128xbf16>, vector<128x384xbf16>, vector<8x384xf32> -> vector<8x384xf32>
    %241 = vector.extract_strided_slice %238 {offsets = [0, 0], sizes = [8, 128], strides = [1, 1]} : vector<8x384xf32> to vector<8x128xf32>
    %242 = vector.extract_strided_slice %240 {offsets = [0, 0], sizes = [8, 128], strides = [1, 1]} : vector<8x384xf32> to vector<8x128xf32>
    %243 = arith.addf %241, %242 : vector<8x128xf32>
    %244 = arith.negf %243 : vector<8x128xf32>
    %245 = math.exp %244 : vector<8x128xf32>
    %cst_66 = arith.constant 1.000000e+00 : f32
    %246 = vector.broadcast %cst_66 : f32 to vector<8x128xf32>
    %247 = arith.addf %246, %245 : vector<8x128xf32>
    %248 = arith.divf %246, %247 : vector<8x128xf32>
    %249 = vector.extract_strided_slice %238 {offsets = [0, 128], sizes = [8, 128], strides = [1, 1]} : vector<8x384xf32> to vector<8x128xf32>
    %250 = vector.extract_strided_slice %240 {offsets = [0, 128], sizes = [8, 128], strides = [1, 1]} : vector<8x384xf32> to vector<8x128xf32>
    %251 = arith.addf %249, %250 : vector<8x128xf32>
    %252 = arith.negf %251 : vector<8x128xf32>
    %253 = math.exp %252 : vector<8x128xf32>
    %cst_67 = arith.constant 1.000000e+00 : f32
    %254 = vector.broadcast %cst_67 : f32 to vector<8x128xf32>
    %255 = arith.addf %254, %253 : vector<8x128xf32>
    %256 = arith.divf %254, %255 : vector<8x128xf32>
    %257 = vector.extract_strided_slice %238 {offsets = [0, 256], sizes = [8, 128], strides = [1, 1]} : vector<8x384xf32> to vector<8x128xf32>
    %258 = vector.extract_strided_slice %240 {offsets = [0, 256], sizes = [8, 128], strides = [1, 1]} : vector<8x384xf32> to vector<8x128xf32>
    %259 = arith.addf %258, %12 : vector<8x128xf32>
    %260 = arith.mulf %248, %259 : vector<8x128xf32>
    %261 = arith.addf %257, %260 : vector<8x128xf32>
    %262 = math.tanh %261 : vector<8x128xf32>
    %cst_68 = arith.constant 1.000000e+00 : f32
    %263 = vector.broadcast %cst_68 : f32 to vector<8x128xf32>
    %264 = arith.subf %263, %256 : vector<8x128xf32>
    %265 = arith.mulf %264, %262 : vector<8x128xf32>
    %266 = arith.mulf %256, %230 : vector<8x128xf32>
    %267 = arith.addf %265, %266 : vector<8x128xf32>
    %268 = arith.truncf %267 : vector<8x128xf32> to vector<8x128xbf16>
    %269 = arith.index_cast %c6_i32 : i32 to index
    %c0_69 = arith.constant 0 : index
    %c0_70 = arith.constant 0 : index
    %270 = vector.load %arg7[%269, %c0_69, %c0_70] : memref<8x8x128xbf16, #tpu.memory_space<vmem>>, vector<1x8x128xbf16>
    %271 = vector.shape_cast %270 : vector<1x8x128xbf16> to vector<8x128xbf16>
    %272 = vector.shape_cast %268 : vector<8x128xbf16> to vector<1x8x128xbf16>
    tpu.vector_store %arg7[%269, %c0_69, %c0_70], %272 {strides = array<i32>} : memref<8x8x128xbf16, #tpu.memory_space<vmem>>, vector<1x8x128xbf16>,
    %c7_i32 = arith.constant 7 : i32
    %273 = arith.index_cast %c7_i32 : i32 to index
    %c0_71 = arith.constant 0 : index
    %c0_72 = arith.constant 0 : index
    %274 = vector.load %arg8[%273, %c0_71, %c0_72] : memref<8x8x384xf32, #tpu.memory_space<vmem>>, vector<1x8x384xf32>
    %275 = vector.shape_cast %274 : vector<1x8x384xf32> to vector<8x384xf32>
    %276 = arith.truncf %267 : vector<8x128xf32> to vector<8x128xbf16>
    %cst_73 = arith.constant dense<0.000000e+00> : vector<8x384xf32>
    %277 = tpu.matmul %276, %9, %cst_73 {dimension_numbers = #tpu.dot_dimension_numbers<[1], [0], [0], [1], [0, 0, 1, 1], [], []>} : vector<8x128xbf16>, vector<128x384xbf16>, vector<8x384xf32> -> vector<8x384xf32>
    %278 = vector.extract_strided_slice %275 {offsets = [0, 0], sizes = [8, 128], strides = [1, 1]} : vector<8x384xf32> to vector<8x128xf32>
    %279 = vector.extract_strided_slice %277 {offsets = [0, 0], sizes = [8, 128], strides = [1, 1]} : vector<8x384xf32> to vector<8x128xf32>
    %280 = arith.addf %278, %279 : vector<8x128xf32>
    %281 = arith.negf %280 : vector<8x128xf32>
    %282 = math.exp %281 : vector<8x128xf32>
    %cst_74 = arith.constant 1.000000e+00 : f32
    %283 = vector.broadcast %cst_74 : f32 to vector<8x128xf32>
    %284 = arith.addf %283, %282 : vector<8x128xf32>
    %285 = arith.divf %283, %284 : vector<8x128xf32>
    %286 = vector.extract_strided_slice %275 {offsets = [0, 128], sizes = [8, 128], strides = [1, 1]} : vector<8x384xf32> to vector<8x128xf32>
    %287 = vector.extract_strided_slice %277 {offsets = [0, 128], sizes = [8, 128], strides = [1, 1]} : vector<8x384xf32> to vector<8x128xf32>
    %288 = arith.addf %286, %287 : vector<8x128xf32>
    %289 = arith.negf %288 : vector<8x128xf32>
    %290 = math.exp %289 : vector<8x128xf32>
    %cst_75 = arith.constant 1.000000e+00 : f32
    %291 = vector.broadcast %cst_75 : f32 to vector<8x128xf32>
    %292 = arith.addf %291, %290 : vector<8x128xf32>
    %293 = arith.divf %291, %292 : vector<8x128xf32>
    %294 = vector.extract_strided_slice %275 {offsets = [0, 256], sizes = [8, 128], strides = [1, 1]} : vector<8x384xf32> to vector<8x128xf32>
    %295 = vector.extract_strided_slice %277 {offsets = [0, 256], sizes = [8, 128], strides = [1, 1]} : vector<8x384xf32> to vector<8x128xf32>
    %296 = arith.addf %295, %12 : vector<8x128xf32>
    %297 = arith.mulf %285, %296 : vector<8x128xf32>
    %298 = arith.addf %294, %297 : vector<8x128xf32>
    %299 = math.tanh %298 : vector<8x128xf32>
    %cst_76 = arith.constant 1.000000e+00 : f32
    %300 = vector.broadcast %cst_76 : f32 to vector<8x128xf32>
    %301 = arith.subf %300, %293 : vector<8x128xf32>
    %302 = arith.mulf %301, %299 : vector<8x128xf32>
    %303 = arith.mulf %293, %267 : vector<8x128xf32>
    %304 = arith.addf %302, %303 : vector<8x128xf32>
    %305 = arith.truncf %304 : vector<8x128xf32> to vector<8x128xbf16>
    %306 = arith.index_cast %c7_i32 : i32 to index
    %c0_77 = arith.constant 0 : index
    %c0_78 = arith.constant 0 : index
    %307 = vector.load %arg7[%306, %c0_77, %c0_78] : memref<8x8x128xbf16, #tpu.memory_space<vmem>>, vector<1x8x128xbf16>
    %308 = vector.shape_cast %307 : vector<1x8x128xbf16> to vector<8x128xbf16>
    %309 = vector.shape_cast %305 : vector<8x128xbf16> to vector<1x8x128xbf16>
    tpu.vector_store %arg7[%306, %c0_77, %c0_78], %309 {strides = array<i32>} : memref<8x8x128xbf16, #tpu.memory_space<vmem>>, vector<1x8x128xbf16>,
    %c8_i32 = arith.constant 8 : i32
    return
  }
  func.func @transform_0(%arg0: i32) -> (i32, i32, i32) {
    %c0_i32 = arith.constant 0 : i32
    %c0_i32_0 = arith.constant 0 : i32
    %c0_i32_1 = arith.constant 0 : i32
    return %c0_i32, %arg0, %c0_i32_0 : i32, i32, i32
  }
  func.func @transform_1(%arg0: i32) -> (i32, i32) {
    %c0_i32 = arith.constant 0 : i32
    %c0_i32_0 = arith.constant 0 : i32
    return %arg0, %c0_i32 : i32, i32
  }
  func.func @transform_2(%arg0: i32) -> (i32, i32) {
    %c0_i32 = arith.constant 0 : i32
    %c0_i32_0 = arith.constant 0 : i32
    %c0_i32_1 = arith.constant 0 : i32
    return %c0_i32, %c0_i32_0 : i32, i32
  }
  func.func @transform_3(%arg0: i32) -> (i32, i32) {
    %c0_i32 = arith.constant 0 : i32
    %c0_i32_0 = arith.constant 0 : i32
    %c0_i32_1 = arith.constant 0 : i32
    return %c0_i32, %c0_i32_0 : i32, i32
  }
  func.func @transform_4(%arg0: i32) -> (i32, i32) {
    %c0_i32 = arith.constant 0 : i32
    %c0_i32_0 = arith.constant 0 : i32
    %c0_i32_1 = arith.constant 0 : i32
    return %c0_i32, %c0_i32_0 : i32, i32
  }
  func.func @transform_5(%arg0: i32) -> (i32, i32) {
    %c0_i32 = arith.constant 0 : i32
    %c0_i32_0 = arith.constant 0 : i32
    %c0_i32_1 = arith.constant 0 : i32
    return %c0_i32, %c0_i32_0 : i32, i32
  }
  func.func @transform_6(%arg0: i32) -> (i32, i32, i32) {
    %c0_i32 = arith.constant 0 : i32
    %c0_i32_0 = arith.constant 0 : i32
    %c0_i32_1 = arith.constant 0 : i32
    return %c0_i32, %arg0, %c0_i32_0 : i32, i32, i32
  }
}

</mosaic_0001>

<bundles_post_ra>
// kernel: tpu_custom_call.1
= control target key start
LH: loop header
LB: loop body
LE: loop exit
PB: predicated region body
PF: predicated region fallthrough
CT: control target
= control target key end

     0   :  { %11 = vsyncpa [#allocation4], 0  ;;  %s2706_s0 = inlined_call_operand.hbm [shape: bf16[8,8,128], index: 0, kind: input, shape index: {}]   ;;  %s2707_s1 = inlined_call_operand.hbm [shape: f32[8,128], index: 1, kind: input, shape index: {}]   ;;  %s2708_s2 = inlined_call_operand.hbm [shape: bf16[128,384], index: 2, kind: input, shape index: {}]   ;;  %s2709_s3 = inlined_call_operand.hbm [shape: bf16[128,384], index: 3, kind: input, shape index: {}]   ;;  %s2710_s4 = inlined_call_operand.vmem [shape: f32[1,384], index: 4, kind: input, shape index: {}]   ;;  %s2711_s5 = inlined_call_operand.vmem [shape: f32[1,128], index: 5, kind: input, shape index: {}]   ;;  %s2712_s6 = inlined_call_operand.hbm [shape: bf16[8,8,128], index: 6, kind: output, shape index: {}]  }
   0x1   :  { %12 = vsyncpa [#allocation7], 0 }
   0x2   :  { %13 = vsyncpa [#allocation10], 0 }
   0x3   :  { %14 = vsyncpa [#allocation5], 0  ;;  %s2151_s21 = smov [#allocation6]   ;;  %s2152_s23 = smov [#allocation3]  }
   0x4   :  { %s33_s22 = sshll.u32 %s2151_s21, 4  ;;  %s20_s24 = sshll.u32 %s2152_s23, 4  ;;  %s34_s22 = int_to_ptr.vmem [resolvable:$true] %s33_s22  ;;  %s2198_s24 = int_to_ptr.vmem [resolvable:$true] %s20_s24 }
   0x5   :  { %s2033_s27 = scalar_lea.hbm %s2707_s1, 128 }
   0x6   :  { %p2034_p0 = scmp.ne.s32.totalorder %s2707_s1, %s2033_s27  ;;  %p2037_p1 = scmp.lt.u32.totalorder %s2033_s27, %s2707_s1 }
   0x8   :  { %p2039_p2 = pnand %p2037_p1, %p2034_p0 }
   0xa   :  { %2042 = shalt.err (!%p2039_p2)
}
   0xb   :  { %s2043_s8 = scalar_lea.vmem %s34_s22, 128  ;;  %p2048_p4 = scmp.lt.s32.totalorder %s34_s22, %s34_s22 }
   0xc   :  { %p2044_p3 = scmp.ne.s32.totalorder %s34_s22, %s2043_s8  ;;  %p2049_p5 = scmp.lt.s32.totalorder %s2043_s8, %s2043_s8 }
   0xe   :  { %p2050_p6 = por %p2049_p5, %p2048_p4 }
  0x10   :  { %p2051_p7 = pnand %p2050_p6, %p2044_p3 }
  0x12   :  { %2054 = shalt.err (!%p2051_p7)
}
  0x13   :  { %36 = dma.hbm_to_vmem [thread:$0]  %s2707_s1, 128, %s34_s22, [#allocation7]  }
  0x14   :  { %s2055_s13 = scalar_lea.hbm %s2706_s0, 512 }
  0x15   :  { %p2056_p8 = scmp.ne.s32.totalorder %s2706_s0, %s2055_s13  ;;  %p2059_p9 = scmp.lt.u32.totalorder %s2055_s13, %s2706_s0 }
  0x17   :  { %p2061_p10 = pnand %p2059_p9, %p2056_p8 }
  0x19   :  { %2064 = shalt.err (!%p2061_p10)
}
  0x1a   :  { %s2065_s18 = scalar_lea.vmem %s2198_s24, 512  ;;  %p2070_p12 = scmp.lt.s32.totalorder %s2198_s24, %s2198_s24 }
  0x1b   :  { %p2066_p11 = scmp.ne.s32.totalorder %s2198_s24, %s2065_s18  ;;  %p2071_p13 = scmp.lt.s32.totalorder %s2065_s18, %s2065_s18 }
  0x1d   :  { %p2072_p0 = por %p2071_p13, %p2070_p12 }
  0x1f   :  { %p2073_p1 = pnand %p2072_p0, %p2066_p11 }
  0x21   :  { %2076 = shalt.err (!%p2073_p1)
}
  0x22   :  { %s2153_s1 = smov 64   ;;  %s2154_s19 = smov 4  }
  0x23   :  { %26 = dma.hbm_to_vmem [thread:$0]  %s2706_s0, 512, %s2198_s24, [#allocation4], %s2153_s1, %s2153_s1, %s2154_s19  }
  0x24   :  { %s2155_s22 = smov [#allocation8]   ;;  %s2077_s27 = scalar_lea.hbm %s2708_s2, 3072 }
  0x25   :  { %s42_s23 = sshll.u32 %s2155_s22, 4  ;;  %p2078_p2 = scmp.ne.s32.totalorder %s2708_s2, %s2077_s27  ;;  %s43_s23 = int_to_ptr.vmem [resolvable:$true] %s42_s23 }
  0x26   :  { %p2081_p3 = scmp.lt.u32.totalorder %s2077_s27, %s2708_s2 }
  0x28   :  { %p2083_p4 = pnand %p2081_p3, %p2078_p2 }
  0x2a   :  { %2086 = shalt.err (!%p2083_p4)
}
  0x2b   :  { %s2087_s8 = scalar_lea.vmem %s43_s23, 3072  ;;  %p2092_p6 = scmp.lt.s32.totalorder %s43_s23, %s43_s23 }
  0x2c   :  { %p2088_p5 = scmp.ne.s32.totalorder %s43_s23, %s2087_s8  ;;  %p2093_p7 = scmp.lt.s32.totalorder %s2087_s8, %s2087_s8 }
  0x2e   :  { %p2094_p8 = por %p2093_p7, %p2092_p6 }
  0x30   :  { %p2095_p9 = pnand %p2094_p8, %p2088_p5 }
  0x32   :  { %2098 = shalt.err (!%p2095_p9)
}
  0x33   :  { %s2156_s0 = smov 192   ;;  %s2157_s24 = smov 12  }
  0x34   :  { %48 = dma.hbm_to_vmem [thread:$0]  %s2708_s2, 3072, %s43_s23, [#allocation7], %s2156_s0, %s2156_s0, %s2157_s24  }
  0x35   :  { %s2158_s11 = smov [#allocation9]   ;;  %s2099_s15 = scalar_lea.hbm %s2709_s3, 3072 }
  0x36   :  { %s54_s12 = sshll.u32 %s2158_s11, 4  ;;  %p2100_p10 = scmp.ne.s32.totalorder %s2709_s3, %s2099_s15  ;;  %s55_s12 = int_to_ptr.vmem [resolvable:$true] %s54_s12 }
  0x37   :  { %p2103_p11 = scmp.lt.u32.totalorder %s2099_s15, %s2709_s3 }
  0x39   :  { %p2105_p12 = pnand %p2103_p11, %p2100_p10 }
  0x3b   :  { %2108 = shalt.err (!%p2105_p12)
}
  0x3c   :  { %s2109_s21 = scalar_lea.vmem %s55_s12, 3072  ;;  %p2114_p0 = scmp.lt.s32.totalorder %s55_s12, %s55_s12 }
  0x3d   :  { %p2110_p13 = scmp.ne.s32.totalorder %s55_s12, %s2109_s21  ;;  %p2115_p1 = scmp.lt.s32.totalorder %s2109_s21, %s2109_s21 }
  0x3f   :  { %p2116_p2 = por %p2115_p1, %p2114_p0 }
  0x41   :  { %p2117_p3 = pnand %p2116_p2, %p2110_p13 }
  0x43   :  { %2120 = shalt.err (!%p2117_p3)
}
  0x44   :  { %60 = dma.hbm_to_vmem [thread:$0]  %s2709_s3, 3072, %s55_s12, [#allocation10], %s2156_s0, %s2156_s0, %s2157_s24  }
  0x45   :  { %2143 = dma.done.wait [#allocation4], 512  }
  0x46   :  { %2144 = vsyncadd [#allocation4], 4294966784 }
  0x47   :  { %2145 = dma.done.wait [#allocation7], 3200  }
  0x48   :  { %2146 = vsyncadd [#allocation7], 4294964096 }
  0x49   :  { %2147 = dma.done.wait [#allocation10], 3072  }
  0x4a   :  { %2148 = vsyncadd [#allocation10], 4294964224  ;;  %v2713_v0 = vmov 0   ;;  %v1864_v1 = vld [vmem:[#allocation8 + $0x4] ss:$12 sps:$4 sm:$0xff]   ;;  %v1890_v12 = vld [vmem:[#allocation3] sm:$0xff]   ;;  %v120_v56 = vlaneseq }
  0x4b   :  { %319 = vmatprep.mubr.bf16.mxu0 %v2713_v0  ;;  %v1866_v2 = vld [vmem:[#allocation8] ss:$12 sps:$4 sm:$0xff]   ;;  %287 = vmatprep.subr.bf16.mxu0 %v1864_v1  ;;  %v1867_v3 = vld [vmem:[#allocation8 + $0x1c] ss:$12 sps:$4 sm:$0xff]   ;;  %v1869_v4 = vld [vmem:[#allocation8 + $0x18] ss:$12 sps:$4 sm:$0xff]  }
  0x4c   :  { %288 = vmatpush1.bf16.msra.mxu0 %v1866_v2  ;;  %v1870_v5 = vld [vmem:[#allocation8 + $0x34] ss:$12 sps:$4 sm:$0xff]   ;;  %v1872_v6 = vld [vmem:[#allocation8 + $0x30] ss:$12 sps:$4 sm:$0xff]   ;;  %v1873_v7 = vld [vmem:[#allocation8 + $0x4c] ss:$12 sps:$4 sm:$0xff]   ;;  %1684 = vmatprep.mubr.bf16.mxu1 %v1890_v12 }
  0x4d   :  { %289 = vmatprep.subr.bf16.mxu0 %v1867_v3  ;;  %v1884_v8 = vld [vmem:[#allocation8 + $0x8] ss:$12 sps:$4 sm:$0xff]   ;;  %v1876_v10 = vld [vmem:[#allocation8 + $0x64] ss:$12 sps:$4 sm:$0xff]   ;;  %v1888_v11 = vld [vmem:[#allocation8 + $0x20] ss:$12 sps:$4 sm:$0xff]  }
  0x4e   :  { %v1875_v9 = vld [vmem:[#allocation8 + $0x48] ss:$12 sps:$4 sm:$0xff]   ;;  %1668 = vmatprep.subr.bf16.mxu1 %v1884_v8  ;;  %v1891_v13 = vld [vmem:[#allocation8 + $0x38] ss:$12 sps:$4 sm:$0xff]   ;;  %v1878_v14 = vld [vmem:[#allocation8 + $0x60] ss:$12 sps:$4 sm:$0xff]  }
  0x4f   :  { %1669 = vmatpush3.bf16.msra.mxu1 %v1884_v8  ;;  %v1879_v15 = vld [vmem:[#allocation8 + $0x7c] ss:$12 sps:$4 sm:$0xff]   ;;  %v1881_v17 = vld [vmem:[#allocation8 + $0x78] ss:$12 sps:$4 sm:$0xff]   ;;  %v1882_v18 = vld [vmem:[#allocation8 + $0x94] ss:$12 sps:$4 sm:$0xff]  }
  0x50   :  { %290 = vmatpush1.bf16.msra.mxu0 %v1869_v4  ;;  %1670 = vmatprep.subr.bf16.mxu1 %v1888_v11  ;;  %v1895_v16 = vld [vmem:[#allocation8 + $0x50] ss:$12 sps:$4 sm:$0xff]   ;;  %v1900_v19 = vld [vmem:[#allocation8 + $0x68] ss:$12 sps:$4 sm:$0xff]   ;;  %v1886_v21 = vld [vmem:[#allocation8 + $0xac] ss:$12 sps:$4 sm:$0xff]  }
  0x51   :  { %291 = vmatprep.subr.bf16.mxu0 %v1870_v5  ;;  %v1885_v20 = vld [vmem:[#allocation8 + $0x90] ss:$12 sps:$4 sm:$0xff]   ;;  %v1904_v22 = vld [vmem:[#allocation8 + $0x80] ss:$12 sps:$4 sm:$0xff]   ;;  %v1889_v23 = vld [vmem:[#allocation8 + $0xa8] ss:$12 sps:$4 sm:$0xff]  }
  0x52   :  { %v2257_v24 = vld [vmem:[#allocation9 + $0x4] ss:$12 sps:$4 sm:$0xff]   ;;  %v2259_v26 = vld [vmem:[#allocation9] ss:$12 sps:$4 sm:$0xff]   ;;  %v2262_v27 = vld [vmem:[#allocation9 + $0x1c] ss:$12 sps:$4 sm:$0xff]  }
  0x53   :  { %1671 = vmatpush3.bf16.msra.mxu1 %v1888_v11  ;;  %v1909_v25 = vld [vmem:[#allocation8 + $0x98] ss:$12 sps:$4 sm:$0xff]   ;;  %v1913_v28 = vld [vmem:[#allocation8 + $0xb0] ss:$12 sps:$4 sm:$0xff]   ;;  %v2269_v30 = vld [vmem:[#allocation9 + $0x34] ss:$12 sps:$4 sm:$0xff]  }
  0x54   :  { %292 = vmatpush1.bf16.msra.mxu0 %v1872_v6  ;;  %1672 = vmatprep.subr.bf16.mxu1 %v1891_v13  ;;  %v2265_v29 = vld [vmem:[#allocation9 + $0x18] ss:$12 sps:$4 sm:$0xff]   ;;  %v2272_v32 = vld [vmem:[#allocation9 + $0x30] ss:$12 sps:$4 sm:$0xff]   ;;  %v2715_v34 = vmov 0.0   ;;  %v1908_v37 = vld [vmem:[#allocation3 + $0x10] sm:$0xff]  }
  0x55   :  { %293 = vmatprep.subr.bf16.mxu0 %v1873_v7  ;;  %v1899_v31 = vld [vmem:[#allocation3 + $0x8] sm:$0xff]   ;;  %v2275_v33 = vld [vmem:[#allocation9 + $0x4c] ss:$12 sps:$4 sm:$0xff]   ;;  %v2278_v35 = vld [vmem:[#allocation9 + $0x8] ss:$12 sps:$4 sm:$0xff]   ;;  %vm2161_vm0 = vmmov 0  }
  0x56   :  { %v2281_v36 = vld [vmem:[#allocation9 + $0x48] ss:$12 sps:$4 sm:$0xff]   ;;  %v2285_v38 = vld [vmem:[#allocation9 + $0x64] ss:$12 sps:$4 sm:$0xff]   ;;  %v2288_v39 = vld [vmem:[#allocation9 + $0x20] ss:$12 sps:$4 sm:$0xff]  }
  0x57   :  { %1673 = vmatpush3.bf16.msra.mxu1 %v1891_v13  ;;  %v2292_v40 = vld [vmem:[#allocation9 + $0x60] ss:$12 sps:$4 sm:$0xff]   ;;  %v2295_v41 = vld [vmem:[#allocation9 + $0x7c] ss:$12 sps:$4 sm:$0xff]   ;;  %v2298_v42 = vld [vmem:[#allocation9 + $0x38] ss:$12 sps:$4 sm:$0xff]  }
  0x58   :  { %294 = vmatpush1.bf16.msra.mxu0 %v1875_v9  ;;  %1674 = vmatprep.subr.bf16.mxu1 %v1895_v16  ;;  %v1917_v43 = vld [vmem:[#allocation3 + $0x18] sm:$0xff]   ;;  %v2302_v44 = vld [vmem:[#allocation9 + $0x78] ss:$12 sps:$4 sm:$0xff]   ;;  %v2332_v52 = vld [vmem:[#allocation9 + $0x80] ss:$12 sps:$4 sm:$0xff]   ;;  %v121_v57 = vshrl.u32 %v120_v56, 7 }
  0x59   :  { %295 = vmatprep.subr.bf16.mxu0 %v1876_v10  ;;  %v2306_v45 = vld [vmem:[#allocation9 + $0x94] ss:$12 sps:$4 sm:$0xff]   ;;  %v2309_v46 = vld [vmem:[#allocation9 + $0x50] ss:$12 sps:$4 sm:$0xff]   ;;  %v2318_v48 = vld [vmem:[#allocation9 + $0xac] ss:$12 sps:$4 sm:$0xff]  }
  0x5a   :  { %v2315_v47 = vld [vmem:[#allocation9 + $0x90] ss:$12 sps:$4 sm:$0xff]   ;;  %v2321_v49 = vld [vmem:[#allocation9 + $0x68] ss:$12 sps:$4 sm:$0xff]   ;;  %v2340_v54 = vld [vmem:[#allocation9 + $0x98] ss:$12 sps:$4 sm:$0xff]  }
  0x5b   :  { %1675 = vmatpush3.bf16.msra.mxu1 %v1895_v16  ;;  %v2325_v50 = vld [vmem:[#allocation9 + $0xa8] ss:$12 sps:$4 sm:$0xff]   ;;  %v2328_v51 = vld [vmem:[#allocation6] sm:$0xff]  ;;  %v122_v58 = vsub.s32 0, %v121_v57  ;;  %v126_v60 = vsub.s32 1, %v121_v57  ;;  %v130_v5 = vsub.s32 2, %v121_v57 }
  0x5c   :  { %296 = vmatpush1.bf16.msra.mxu0 %v1878_v14  ;;  %1676 = vmatprep.subr.bf16.mxu1 %v1900_v19  ;;  %v492_v53 = vpack.c.bf16 %v2328_v51, %v2328_v51  ;;  %v2347_v55 = vld [vmem:[#allocation9 + $0xb0] ss:$12 sps:$4 sm:$0xff]   ;;  %v118_v59 = vld [vmem:[%s2710_s4] sm:$0x7] }
  0x5d   :  { %297 = vmatprep.subr.bf16.mxu0 %v1879_v15  ;;  %v123_v62 = vrot.slane %v118_v59, %v122_v58  ;;  %v127_v1 = vrot.slane %v118_v59, %v126_v60  ;;  %v2391_v7 = vrot.slane %v118_v59, %v130_v5 }
  0x5f   :  { %1677 = vmatpush3.bf16.msra.mxu1 %v1900_v19 }
  0x60   :  { %298 = vmatpush1.bf16.msra.mxu0 %v1881_v17  ;;  %1678 = vmatprep.subr.bf16.mxu1 %v1904_v22 }
  0x61   :  { %299 = vmatprep.subr.bf16.mxu0 %v1882_v18 }
  0x63   :  { %1679 = vmatpush3.bf16.msra.mxu1 %v1904_v22 }
  0x64   :  { %300 = vmatpush1.bf16.msra.mxu0 %v1885_v20  ;;  %1680 = vmatprep.subr.bf16.mxu1 %v1909_v25 }
  0x65   :  { %301 = vmatprep.subr.bf16.mxu0 %v1886_v21 }
  0x67   :  { %1681 = vmatpush3.bf16.msra.mxu1 %v1909_v25 }
  0x68   :  { %302 = vmatpush1.bf16.msra.mxu0 %v1889_v23  ;;  %1682 = vmatprep.subr.bf16.mxu1 %v1913_v28 }
  0x69   :  { %621 = vmatprep.subr.bf16.mxu0 %v2257_v24 }
  0x6b   :  { %320 = vmatmul.mubr.bf16.vlgmr.msra.gmra.mrb[0].mxu0 %v1890_v12  ;;  %1683 = vmatpush3.bf16.msra.mxu1 %v1913_v28 }
  0x6c   :  { %622 = vmatpush1.bf16.msra.mxu0 %v2259_v26  ;;  %329 = vmatprep.mubr.bf16.mxu0 %v2713_v0 }
  0x6d   :  { %623 = vmatprep.subr.bf16.mxu0 %v2262_v27  ;;  %1692 = vmatprep.subr.bf16.mxu1 %v2715_v34 }
  0x6e   :  { %1685 = vmatmul.mubr.bf16.vlgmr.msra.gmra.mrb[0].mxu1 %v1899_v31 }
  0x6f   :  { %1693 = vmatpush3.bf16.msra.mxu1 %v2278_v35  ;;  %1688 = vmatprep.mubr.bf16.mxu1 %v1908_v37 }
  0x70   :  { %624 = vmatpush1.bf16.msra.mxu0 %v2265_v29  ;;  %1694 = vmatprep.subr.bf16.mxu1 %v2715_v34 }
  0x71   :  { %625 = vmatprep.subr.bf16.mxu0 %v2269_v30 }
  0x73   :  { %330 = vmatmul.mubr.bf16.gmra.mrb[4].mxu0 %v1899_v31  ;;  %1695 = vmatpush3.bf16.msra.mxu1 %v2288_v39 }
  0x74   :  { %626 = vmatpush1.bf16.msra.mxu0 %v2272_v32  ;;  %339 = vmatprep.mubr.bf16.mxu0 %v2713_v0 }
  0x75   :  { %627 = vmatprep.subr.bf16.mxu0 %v2275_v33  ;;  %1696 = vmatprep.subr.bf16.mxu1 %v2715_v34 }
  0x76   :  { %1689 = vmatmul.mubr.bf16.gmra.mrb[4].mxu1 %v1917_v43 }
  0x77   :  { %1697 = vmatpush3.bf16.msra.mxu1 %v2298_v42  ;;  %1708 = vmatprep.mubr.msk.bf16.mxu1 %vm2161_vm0, %v2715_v34 }
  0x78   :  { %628 = vmatpush1.bf16.msra.mxu0 %v2281_v36  ;;  %1698 = vmatprep.subr.bf16.mxu1 %v2715_v34 }
  0x79   :  { %629 = vmatprep.subr.bf16.mxu0 %v2285_v38 }
  0x7b   :  { %340 = vmatmul.mubr.bf16.gmra.mrb[8].mxu0 %v1908_v37  ;;  %1699 = vmatpush3.bf16.msra.mxu1 %v2309_v46 }
  0x7c   :  { %630 = vmatpush1.bf16.msra.mxu0 %v2292_v40  ;;  %349 = vmatprep.mubr.bf16.mxu0 %v2713_v0 }
  0x7d   :  { %631 = vmatprep.subr.bf16.mxu0 %v2295_v41  ;;  %1700 = vmatprep.subr.bf16.mxu1 %v2715_v34 }
  0x7f   :  { %1701 = vmatpush3.bf16.msra.mxu1 %v2321_v49 }
  0x80   :  { %632 = vmatpush1.bf16.msra.mxu0 %v2302_v44  ;;  %1702 = vmatprep.subr.bf16.mxu1 %v2715_v34 }
  0x81   :  { %633 = vmatprep.subr.bf16.mxu0 %v2306_v45 }
  0x83   :  { %350 = vmatmul.mubr.bf16.gmra.mrb[12].mxu0 %v1917_v43  ;;  %1703 = vmatpush3.bf16.msra.mxu1 %v2332_v52 }
  0x84   :  { %634 = vmatpush1.bf16.msra.mxu0 %v2315_v47  ;;  %653 = vmatprep.mubr.bf16.mxu0 %v2713_v0 }
  0x85   :  { %635 = vmatprep.subr.bf16.mxu0 %v2318_v48  ;;  %1704 = vmatprep.subr.bf16.mxu1 %v2715_v34 }
  0x87   :  { %1705 = vmatpush3.bf16.msra.mxu1 %v2340_v54 }
  0x88   :  { %636 = vmatpush1.bf16.msra.mxu0 %v2325_v50  ;;  %1706 = vmatprep.subr.bf16.mxu1 %v2715_v34 }
  0x89   :  { %730 = vmatprep.subr.bf16.mxu0 %v2257_v24 }
  0x8b   :  { %654 = vmatmul.mubr.bf16.vlgmr.msra.gmra.mrb[16].mxu0 %v492_v53  ;;  %1707 = vmatpush3.bf16.msra.mxu1 %v2347_v55 }
  0x8c   :  { %731 = vmatpush1.bf16.msra.mxu0 %v2259_v26  ;;  %762 = vmatprep.mubr.bf16.mxu0 %v2713_v0 }
  0x8d   :  { %732 = vmatprep.subr.bf16.mxu0 %v2262_v27  ;;  %1712 = vmatprep.subr.bf16.mxu1 %v2715_v34 }
  0x8e   :  { %1709 = vmatmul.mubr.bf16.vlgmr.msra.gmra.mrb[8].mxu1 %v492_v53 }
  0x8f   :  { %1713 = vmatpush3.bf16.msra.mxu1 %v2278_v35  ;;  %1728 = vmatprep.mubr.msk.bf16.mxu1 %vm2161_vm0, %v2715_v34 }
  0x90   :  { %733 = vmatpush1.bf16.msra.mxu0 %v2265_v29  ;;  %1714 = vmatprep.subr.bf16.mxu1 %v2715_v34 }
  0x91   :  { %734 = vmatprep.subr.bf16.mxu0 %v2269_v30 }
  0x93   :  { %1715 = vmatpush3.bf16.msra.mxu1 %v2288_v39 }
  0x94   :  { %735 = vmatpush1.bf16.msra.mxu0 %v2272_v32  ;;  %1716 = vmatprep.subr.bf16.mxu1 %v2715_v34 }
  0x95   :  { %736 = vmatprep.subr.bf16.mxu0 %v2275_v33 }
  0x97   :  { %1717 = vmatpush3.bf16.msra.mxu1 %v2298_v42 }
  0x98   :  { %737 = vmatpush1.bf16.msra.mxu0 %v2281_v36  ;;  %1718 = vmatprep.subr.bf16.mxu1 %v2715_v34 }
  0x99   :  { %738 = vmatprep.subr.bf16.mxu0 %v2285_v38 }
  0x9b   :  { %1719 = vmatpush3.bf16.msra.mxu1 %v2309_v46 }
  0x9c   :  { %739 = vmatpush1.bf16.msra.mxu0 %v2292_v40  ;;  %1720 = vmatprep.subr.bf16.mxu1 %v2715_v34 }
  0x9d   :  { %740 = vmatprep.subr.bf16.mxu0 %v2295_v41 }
  0x9f   :  { %1721 = vmatpush3.bf16.msra.mxu1 %v2321_v49 }
  0xa0   :  { %741 = vmatpush1.bf16.msra.mxu0 %v2302_v44  ;;  %1722 = vmatprep.subr.bf16.mxu1 %v2715_v34 }
  0xa1   :  { %742 = vmatprep.subr.bf16.mxu0 %v2306_v45 }
  0xa3   :  { %1723 = vmatpush3.bf16.msra.mxu1 %v2332_v52 }
  0xa4   :  { %743 = vmatpush1.bf16.msra.mxu0 %v2315_v47  ;;  %1724 = vmatprep.subr.bf16.mxu1 %v2715_v34 }
  0xa5   :  { %744 = vmatprep.subr.bf16.mxu0 %v2318_v48 }
  0xa7   :  { %1725 = vmatpush3.bf16.msra.mxu1 %v2340_v54 }
  0xa8   :  { %745 = vmatpush1.bf16.msra.mxu0 %v2325_v50  ;;  %1726 = vmatprep.subr.bf16.mxu1 %v2715_v34 }
  0xa9   :  { %840 = vmatprep.subr.bf16.mxu0 %v2257_v24 }
  0xab   :  { %1727 = vmatpush3.bf16.msra.mxu1 %v2347_v55 }
  0xac   :  { %1732 = vmatprep.subr.bf16.mxu1 %v2715_v34 }
 0x13e   :  { %v321_v61 = vpop.f32.mrb[0].mxu0 }
 0x13f   :  { %v323_v63 = vpop.f32.mrb[1].mxu0 }
 0x140   :  { %v325_v2 = vpop.f32.mrb[2].mxu0 }
 0x141   :  { %v2387_v3 = vadd.f32 %v325_v2, %v123_v62  ;;  %v327_v4 = vpop.f32.mrb[3].mxu0  ;;  %v1686_v13 = vpop.f32.mrb[0].mxu1 }
 0x142   :  { %v2389_v6 = vadd.f32 %v327_v4, %v127_v1  ;;  %v2400_v16 = vadd.f32 %v1686_v13, %v2391_v7  ;;  %v394_v17 = vpop.f32.mrb[1].mxu1 }
 0x143   :  { %v1687_v19 = vpop.f32.mrb[2].mxu1 }
 0x144   :  { %v2405_v20 = vadd.f32 %v1687_v19, %v2391_v7  ;;  %v397_v21 = vpop.f32.mrb[3].mxu1 }
 0x145   :  { %v2408_v22 = vadd.f32 %v397_v21, %v2391_v7 }
 0x146   :  { %v331_v8 = vpop.f32.mrb[4].mxu0 }
 0x147   :  { %v2393_v9 = vadd.f32 %v331_v8, %v123_v62  ;;  %v333_v10 = vpop.f32.mrb[5].mxu0 }
 0x148   :  { %v2395_v11 = vadd.f32 %v333_v10, %v127_v1  ;;  %v335_v12 = vpop.f32.mrb[6].mxu0 }
 0x149   :  { %v2397_v14 = vadd.f32 %v335_v12, %v123_v62  ;;  %v337_v15 = vpop.f32.mrb[7].mxu0  ;;  %v1690_v43 = vpop.f32.mrb[4].mxu1 }
 0x14a   :  { %v2402_v18 = vadd.f32 %v337_v15, %v127_v1  ;;  %v2417_v57 = vadd.f32 %v1690_v43, %v2391_v7  ;;  %v410_v58 = vpop.f32.mrb[5].mxu1  ;;  %v324_v43 = vadd.f32 %v323_v63, %v127_v1 }
 0x14b   :  { %v2422_v60 = vadd.f32 %v410_v58, %v2391_v7  ;;  %v1691_v2 = vpop.f32.mrb[6].mxu1 }
 0x14c   :  { %2717 = vst [vmem:[#allocation16_spill] sm:$0xff] %v2417_v57  ;;  %v2425_v4 = vadd.f32 %v1691_v2, %v2391_v7  ;;  %v413_v5 = vpop.f32.mrb[7].mxu1 }
 0x14d   :  { %v2428_v8 = vadd.f32 %v413_v5, %v2391_v7 }
 0x14e   :  { %v341_v23 = vpop.f32.mrb[8].mxu0  ;;  %2718 = vst [vmem:[#allocation17_spill] sm:$0xff] %v2425_v4 }
 0x14f   :  { %v2410_v25 = vadd.f32 %v341_v23, %v123_v62  ;;  %v343_v28 = vpop.f32.mrb[9].mxu0 }
 0x150   :  { %v2412_v31 = vadd.f32 %v343_v28, %v127_v1  ;;  %v345_v37 = vpop.f32.mrb[10].mxu0 }
 0x151   :  { %v2414_v53 = vadd.f32 %v345_v37, %v123_v62  ;;  %v347_v56 = vpop.f32.mrb[11].mxu0  ;;  %v322_v37 = vadd.f32 %v321_v61, %v123_v62  ;;  %v2441_v61 = vld [vmem:[%s2711_s5] ss:$0 sm:$0xff]  ;;  %s2162_s5 = smov [#allocation11]  }
 0x152   :  { %v2419_v59 = vadd.f32 %v347_v56, %v127_v1  ;;  %s1501_s26 = sshll.u32 %s2162_s5, 4  ;;  %s1502_s26 = int_to_ptr.vmem [resolvable:$true] %s1501_s26 }
 0x153   :  { %s2121_s27 = scalar_lea.vmem %s1502_s26, 512  ;;  %p2126_p5 = scmp.lt.s32.totalorder %s1502_s26, %s1502_s26 }
 0x154   :  { %p2122_p4 = scmp.ne.s32.totalorder %s1502_s26, %s2121_s27  ;;  %p2127_p6 = scmp.lt.s32.totalorder %s2121_s27, %s2121_s27 }
 0x156   :  { %v351_v10 = vpop.f32.mrb[12].mxu0  ;;  %p2128_p7 = por %p2127_p6, %p2126_p5 }
 0x157   :  { %v2430_v12 = vadd.f32 %v351_v10, %v123_v62  ;;  %v353_v13 = vpop.f32.mrb[13].mxu0 }
 0x158   :  { %v2432_v15 = vadd.f32 %v353_v13, %v127_v1  ;;  %v355_v19 = vpop.f32.mrb[14].mxu0  ;;  %p2129_p8 = pnand %p2128_p7, %p2122_p4 }
 0x159   :  { %2719 = vst [vmem:[#allocation18_spill] sm:$0xff] %v2430_v12  ;;  %v2434_v21 = vadd.f32 %v355_v19, %v123_v62  ;;  %v357_v23 = vpop.f32.mrb[15].mxu0 }
 0x15a   :  { %2720 = vst [vmem:[#allocation19_spill] sm:$0xff] %v2432_v15  ;;  %v2436_v28 = vadd.f32 %v357_v23, %v127_v1 }
 0x15b   :  { %2721 = vst [vmem:[#allocation20_spill] sm:$0xff] %v2434_v21 }
 0x15e   :  { %v655_v56 = vpop.f32.mrb[16].mxu0 }
 0x15f   :  { %v702_v58 = vadd.f32 %v655_v56, %v322_v37  ;;  %v657_v2 = vpop.f32.mrb[17].mxu0 }
 0x160   :  { %v709_v0 = vadd.f32 %v657_v2, %v324_v43  ;;  %v659_v5 = vpop.f32.mrb[18].mxu0 }
 0x161   :  { %v1568_v34 = vmul.f32 -1.442695, %v702_v58  ;;  %v660_v4 = vpop.f32.mrb[19].mxu0  ;;  %v696_v57 = vpop.f32.mrb[8].mxu1 }
 0x162   :  { %v1569_v10 = vmul.f32 -1.442695, %v709_v0  ;;  %v1710_v13 = vpop.f32.mrb[9].mxu1  ;;  %v716_v63 = vadd.f32 %v2441_v61, %v696_v57  ;;  %v395_v0 = vadd.f32 %v394_v17, %v2391_v7  ;;  %v2722_v7 = vmov 0.0  }
 0x163   :  { %1932 = vpow2.f32 %v1568_v34  ;;  %v699_v15 = vpop.f32.mrb[10].mxu1  ;;  %v2723_v17 = vmov 0  }
 0x164   :  { %1934 = vpow2.f32 %v1569_v10  ;;  %v1711_v19 = vpop.f32.mrb[11].mxu1 }
 0x16d   :  { %v1933_v21 = vpop.eup %1932 }
 0x16e   :  { %v706_v12 = vadd.f32 1.0, %v1933_v21  ;;  %v1935_v23 = vpop.eup %1934 }
 0x16f   :  { %v713_v62 = vadd.f32 1.0, %v1935_v23 }
 0x170   :  { %1936 = vrcp.f32 %v706_v12 }
 0x171   :  { %1938 = vrcp.f32 %v713_v62 }
 0x17a   :  { %v1937_v1 = vpop.eup %1936 }
 0x17b   :  { %v717_v34 = vmul.f32 %v1937_v1, %v716_v63  ;;  %v1939_v15 = vpop.eup %1938 }
 0x17c   :  { %v720_v37 = vsub.f32 1.0, %v1939_v15  ;;  %v722_v43 = vmul.f32 %v1939_v15, %v2328_v51 }
 0x17d   :  { %v718_v4 = vadd.f32 %v717_v34, %v395_v0 }
 0x17f   :  { %1940 = vtanh.f32 %v718_v4 }
 0x189   :  { %v1941_v21 = vpop.eup %1940 }
 0x18a   :  { %v721_v12 = vmul.f32 %v1941_v21, %v720_v37 }
 0x18c   :  { %v2446_v56 = vadd.f32 %v722_v43, %v721_v12 }
 0x18e   :  { %v724_v58 = vpack.c.bf16 %v2446_v56, %v2446_v56 }
 0x190   :  { %725 = vst [vmem:[#allocation11] sm:$0xf] %v724_v58  ;;  %763 = vmatmul.mubr.bf16.vlgmr.msra.gmra.mrb[20].mxu0 %v724_v58  ;;  %1729 = vmatmul.mubr.bf16.vlgmr.msra.gmra.mrb[12].mxu1 %v724_v58 }
 0x191   :  { %841 = vmatpush1.bf16.msra.mxu0 %v2259_v26  ;;  %1733 = vmatpush3.bf16.msra.mxu1 %v2278_v35 }
 0x192   :  { %842 = vmatprep.subr.bf16.mxu0 %v2262_v27  ;;  %1734 = vmatprep.subr.bf16.mxu1 %v2722_v7 }
 0x193   :  { %872 = vmatprep.mubr.bf16.mxu0 %v2723_v17  ;;  %1748 = vmatprep.mubr.msk.bf16.mxu1 %vm2161_vm0, %v2722_v7 }
 0x195   :  { %843 = vmatpush1.bf16.msra.mxu0 %v2265_v29  ;;  %1735 = vmatpush3.bf16.msra.mxu1 %v2288_v39 }
 0x196   :  { %844 = vmatprep.subr.bf16.mxu0 %v2269_v30  ;;  %1736 = vmatprep.subr.bf16.mxu1 %v2722_v7 }
 0x199   :  { %845 = vmatpush1.bf16.msra.mxu0 %v2272_v32  ;;  %1737 = vmatpush3.bf16.msra.mxu1 %v2298_v42 }
 0x19a   :  { %846 = vmatprep.subr.bf16.mxu0 %v2275_v33  ;;  %1738 = vmatprep.subr.bf16.mxu1 %v2722_v7 }
 0x19d   :  { %847 = vmatpush1.bf16.msra.mxu0 %v2281_v36  ;;  %1739 = vmatpush3.bf16.msra.mxu1 %v2309_v46 }
 0x19e   :  { %848 = vmatprep.subr.bf16.mxu0 %v2285_v38  ;;  %1740 = vmatprep.subr.bf16.mxu1 %v2722_v7 }
 0x1a1   :  { %849 = vmatpush1.bf16.msra.mxu0 %v2292_v40  ;;  %1741 = vmatpush3.bf16.msra.mxu1 %v2321_v49 }
 0x1a2   :  { %850 = vmatprep.subr.bf16.mxu0 %v2295_v41  ;;  %1742 = vmatprep.subr.bf16.mxu1 %v2722_v7 }
 0x1a5   :  { %851 = vmatpush1.bf16.msra.mxu0 %v2302_v44  ;;  %1743 = vmatpush3.bf16.msra.mxu1 %v2332_v52 }
 0x1a6   :  { %852 = vmatprep.subr.bf16.mxu0 %v2306_v45  ;;  %1744 = vmatprep.subr.bf16.mxu1 %v2722_v7 }
 0x1a9   :  { %853 = vmatpush1.bf16.msra.mxu0 %v2315_v47  ;;  %1745 = vmatpush3.bf16.msra.mxu1 %v2340_v54 }
 0x1aa   :  { %854 = vmatprep.subr.bf16.mxu0 %v2318_v48  ;;  %1746 = vmatprep.subr.bf16.mxu1 %v2722_v7 }
 0x1ad   :  { %855 = vmatpush1.bf16.msra.mxu0 %v2325_v50  ;;  %1747 = vmatpush3.bf16.msra.mxu1 %v2347_v55 }
 0x1ae   :  { %950 = vmatprep.subr.bf16.mxu0 %v2257_v24  ;;  %1752 = vmatprep.subr.bf16.mxu1 %v2722_v7 }
 0x263   :  { %v764_v51 = vpop.f32.mrb[20].mxu0  ;;  %v805_v57 = vpop.f32.mrb[12].mxu1 }
 0x264   :  { %v811_v2 = vadd.f32 %v764_v51, %v2387_v3  ;;  %v766_v5 = vpop.f32.mrb[21].mxu0  ;;  %v1730_v10 = vpop.f32.mrb[13].mxu1  ;;  %v825_v21 = vadd.f32 %v2441_v61, %v805_v57 }
 0x265   :  { %v818_v13 = vadd.f32 %v766_v5, %v2389_v6  ;;  %v768_v19 = vpop.f32.mrb[22].mxu0  ;;  %v808_v23 = vpop.f32.mrb[14].mxu1 }
 0x266   :  { %v1570_v62 = vmul.f32 -1.442695, %v811_v2  ;;  %v769_v63 = vpop.f32.mrb[23].mxu0  ;;  %v1731_v1 = vpop.f32.mrb[15].mxu1 }
 0x267   :  { %v1571_v0 = vmul.f32 -1.442695, %v818_v13 }
 0x268   :  { %1942 = vpow2.f32 %v1570_v62 }
 0x269   :  { %1944 = vpow2.f32 %v1571_v0 }
 0x272   :  { %v1943_v34 = vpop.eup %1942 }
 0x273   :  { %v815_v4 = vadd.f32 1.0, %v1943_v34  ;;  %v1945_v15 = vpop.eup %1944 }
 0x274   :  { %v822_v37 = vadd.f32 1.0, %v1945_v15 }
 0x275   :  { %1946 = vrcp.f32 %v815_v4 }
 0x276   :  { %1948 = vrcp.f32 %v822_v37 }
 0x27f   :  { %v1947_v3 = vpop.eup %1946 }
 0x280   :  { %v826_v12 = vmul.f32 %v1947_v3, %v825_v21  ;;  %v1949_v43 = vpop.eup %1948 }
 0x281   :  { %v829_v58 = vsub.f32 1.0, %v1949_v43  ;;  %v831_v5 = vmul.f32 %v1949_v43, %v2446_v56 }
 0x282   :  { %v827_v6 = vadd.f32 %v826_v12, %v2408_v22 }
 0x284   :  { %1950 = vtanh.f32 %v827_v6 }
 0x28e   :  { %v1951_v51 = vpop.eup %1950 }
 0x28f   :  { %v830_v2 = vmul.f32 %v1951_v51, %v829_v58 }
 0x291   :  { %v2490_v10 = vadd.f32 %v831_v5, %v830_v2 }
 0x293   :  { %v833_v13 = vpack.c.bf16 %v2490_v10, %v2490_v10 }
 0x295   :  { %835 = vst [vmem:[#allocation11 + $0x4] sm:$0xf] %v833_v13  ;;  %873 = vmatmul.mubr.bf16.vlgmr.msra.gmra.mrb[24].mxu0 %v833_v13  ;;  %1749 = vmatmul.mubr.bf16.vlgmr.msra.gmra.mrb[16].mxu1 %v833_v13 }
 0x296   :  { %951 = vmatpush1.bf16.msra.mxu0 %v2259_v26  ;;  %1753 = vmatpush3.bf16.msra.mxu1 %v2278_v35 }
 0x297   :  { %952 = vmatprep.subr.bf16.mxu0 %v2262_v27  ;;  %1754 = vmatprep.subr.bf16.mxu1 %v2722_v7 }
 0x298   :  { %982 = vmatprep.mubr.bf16.mxu0 %v2723_v17  ;;  %1768 = vmatprep.mubr.msk.bf16.mxu1 %vm2161_vm0, %v2722_v7 }
 0x29a   :  { %953 = vmatpush1.bf16.msra.mxu0 %v2265_v29  ;;  %1755 = vmatpush3.bf16.msra.mxu1 %v2288_v39 }
 0x29b   :  { %954 = vmatprep.subr.bf16.mxu0 %v2269_v30  ;;  %1756 = vmatprep.subr.bf16.mxu1 %v2722_v7 }
 0x29e   :  { %955 = vmatpush1.bf16.msra.mxu0 %v2272_v32  ;;  %1757 = vmatpush3.bf16.msra.mxu1 %v2298_v42 }
 0x29f   :  { %956 = vmatprep.subr.bf16.mxu0 %v2275_v33  ;;  %1758 = vmatprep.subr.bf16.mxu1 %v2722_v7 }
 0x2a2   :  { %957 = vmatpush1.bf16.msra.mxu0 %v2281_v36  ;;  %1759 = vmatpush3.bf16.msra.mxu1 %v2309_v46 }
 0x2a3   :  { %958 = vmatprep.subr.bf16.mxu0 %v2285_v38  ;;  %1760 = vmatprep.subr.bf16.mxu1 %v2722_v7 }
 0x2a6   :  { %959 = vmatpush1.bf16.msra.mxu0 %v2292_v40  ;;  %1761 = vmatpush3.bf16.msra.mxu1 %v2321_v49 }
 0x2a7   :  { %960 = vmatprep.subr.bf16.mxu0 %v2295_v41  ;;  %1762 = vmatprep.subr.bf16.mxu1 %v2722_v7 }
 0x2aa   :  { %961 = vmatpush1.bf16.msra.mxu0 %v2302_v44  ;;  %1763 = vmatpush3.bf16.msra.mxu1 %v2332_v52 }
 0x2ab   :  { %962 = vmatprep.subr.bf16.mxu0 %v2306_v45  ;;  %1764 = vmatprep.subr.bf16.mxu1 %v2722_v7 }
 0x2ae   :  { %963 = vmatpush1.bf16.msra.mxu0 %v2315_v47  ;;  %1765 = vmatpush3.bf16.msra.mxu1 %v2340_v54 }
 0x2af   :  { %964 = vmatprep.subr.bf16.mxu0 %v2318_v48  ;;  %1766 = vmatprep.subr.bf16.mxu1 %v2722_v7 }
 0x2b2   :  { %965 = vmatpush1.bf16.msra.mxu0 %v2325_v50  ;;  %1767 = vmatpush3.bf16.msra.mxu1 %v2347_v55 }
 0x2b3   :  { %1060 = vmatprep.subr.bf16.mxu0 %v2257_v24  ;;  %1772 = vmatprep.subr.bf16.mxu1 %v2722_v7 }
 0x368   :  { %v874_v22 = vpop.f32.mrb[24].mxu0  ;;  %v915_v56 = vpop.f32.mrb[16].mxu1 }
 0x369   :  { %v921_v57 = vadd.f32 %v874_v22, %v2393_v9  ;;  %v876_v19 = vpop.f32.mrb[25].mxu0  ;;  %v1750_v23 = vpop.f32.mrb[17].mxu1  ;;  %v935_v6 = vadd.f32 %v2441_v61, %v915_v56 }
 0x36a   :  { %v928_v62 = vadd.f32 %v876_v19, %v2395_v11  ;;  %v878_v63 = vpop.f32.mrb[26].mxu0  ;;  %v918_v1 = vpop.f32.mrb[18].mxu1 }
 0x36b   :  { %v1572_v0 = vmul.f32 -1.442695, %v921_v57  ;;  %v879_v34 = vpop.f32.mrb[27].mxu0  ;;  %v1751_v4 = vpop.f32.mrb[19].mxu1 }
 0x36c   :  { %v1573_v15 = vmul.f32 -1.442695, %v928_v62 }
 0x36d   :  { %1952 = vpow2.f32 %v1572_v0 }
 0x36e   :  { %1954 = vpow2.f32 %v1573_v15 }
 0x377   :  { %v1953_v37 = vpop.eup %1952 }
 0x378   :  { %v925_v21 = vadd.f32 1.0, %v1953_v37  ;;  %v1955_v3 = vpop.eup %1954 }
 0x379   :  { %v932_v12 = vadd.f32 1.0, %v1955_v3 }
 0x37a   :  { %1956 = vrcp.f32 %v925_v21 }
 0x37b   :  { %1958 = vrcp.f32 %v932_v12 }
 0x384   :  { %v1957_v9 = vpop.eup %1956 }
 0x385   :  { %v936_v43 = vmul.f32 %v1957_v9, %v935_v6  ;;  %v1959_v58 = vpop.eup %1958 }
 0x386   :  { %v939_v51 = vsub.f32 1.0, %v1959_v58  ;;  %v941_v13 = vmul.f32 %v1959_v58, %v2490_v10 }
 0x387   :  { %v937_v11 = vadd.f32 %v936_v43, %v2400_v16 }
 0x389   :  { %1960 = vtanh.f32 %v937_v11 }
 0x393   :  { %v1961_v2 = vpop.eup %1960 }
 0x394   :  { %v940_v5 = vmul.f32 %v1961_v2, %v939_v51 }
 0x396   :  { %v2534_v22 = vadd.f32 %v941_v13, %v940_v5 }
 0x398   :  { %v943_v57 = vpack.c.bf16 %v2534_v22, %v2534_v22 }
 0x39a   :  { %945 = vst [vmem:[#allocation11 + $0x8] sm:$0xf] %v943_v57  ;;  %983 = vmatmul.mubr.bf16.vlgmr.msra.gmra.mrb[28].mxu0 %v943_v57  ;;  %1769 = vmatmul.mubr.bf16.vlgmr.msra.gmra.mrb[20].mxu1 %v943_v57 }
 0x39b   :  { %1061 = vmatpush1.bf16.msra.mxu0 %v2259_v26  ;;  %1773 = vmatpush3.bf16.msra.mxu1 %v2278_v35 }
 0x39c   :  { %1062 = vmatprep.subr.bf16.mxu0 %v2262_v27  ;;  %1774 = vmatprep.subr.bf16.mxu1 %v2722_v7 }
 0x39d   :  { %1092 = vmatprep.mubr.bf16.mxu0 %v2723_v17  ;;  %1788 = vmatprep.mubr.msk.bf16.mxu1 %vm2161_vm0, %v2722_v7 }
 0x39f   :  { %1063 = vmatpush1.bf16.msra.mxu0 %v2265_v29  ;;  %1775 = vmatpush3.bf16.msra.mxu1 %v2288_v39 }
 0x3a0   :  { %1064 = vmatprep.subr.bf16.mxu0 %v2269_v30  ;;  %1776 = vmatprep.subr.bf16.mxu1 %v2722_v7 }
 0x3a3   :  { %1065 = vmatpush1.bf16.msra.mxu0 %v2272_v32  ;;  %1777 = vmatpush3.bf16.msra.mxu1 %v2298_v42 }
 0x3a4   :  { %1066 = vmatprep.subr.bf16.mxu0 %v2275_v33  ;;  %1778 = vmatprep.subr.bf16.mxu1 %v2722_v7 }
 0x3a7   :  { %1067 = vmatpush1.bf16.msra.mxu0 %v2281_v36  ;;  %1779 = vmatpush3.bf16.msra.mxu1 %v2309_v46 }
 0x3a8   :  { %1068 = vmatprep.subr.bf16.mxu0 %v2285_v38  ;;  %1780 = vmatprep.subr.bf16.mxu1 %v2722_v7 }
 0x3ab   :  { %1069 = vmatpush1.bf16.msra.mxu0 %v2292_v40  ;;  %1781 = vmatpush3.bf16.msra.mxu1 %v2321_v49 }
 0x3ac   :  { %1070 = vmatprep.subr.bf16.mxu0 %v2295_v41  ;;  %1782 = vmatprep.subr.bf16.mxu1 %v2722_v7 }
 0x3af   :  { %1071 = vmatpush1.bf16.msra.mxu0 %v2302_v44  ;;  %1783 = vmatpush3.bf16.msra.mxu1 %v2332_v52 }
 0x3b0   :  { %1072 = vmatprep.subr.bf16.mxu0 %v2306_v45  ;;  %1784 = vmatprep.subr.bf16.mxu1 %v2722_v7 }
 0x3b3   :  { %1073 = vmatpush1.bf16.msra.mxu0 %v2315_v47  ;;  %1785 = vmatpush3.bf16.msra.mxu1 %v2340_v54 }
 0x3b4   :  { %1074 = vmatprep.subr.bf16.mxu0 %v2318_v48  ;;  %1786 = vmatprep.subr.bf16.mxu1 %v2722_v7 }
 0x3b7   :  { %1075 = vmatpush1.bf16.msra.mxu0 %v2325_v50  ;;  %1787 = vmatpush3.bf16.msra.mxu1 %v2347_v55 }
 0x3b8   :  { %1170 = vmatprep.subr.bf16.mxu0 %v2257_v24  ;;  %1792 = vmatprep.subr.bf16.mxu1 %v2722_v7 }
 0x46d   :  { %v984_v16 = vpop.f32.mrb[28].mxu0  ;;  %v1025_v10 = vpop.f32.mrb[20].mxu1 }
 0x46e   :  { %v1031_v56 = vadd.f32 %v984_v16, %v2397_v14  ;;  %v986_v19 = vpop.f32.mrb[29].mxu0  ;;  %v1770_v23 = vpop.f32.mrb[21].mxu1  ;;  %v1045_v6 = vadd.f32 %v2441_v61, %v1025_v10 }
 0x46f   :  { %v1038_v62 = vadd.f32 %v986_v19, %v2402_v18  ;;  %v988_v63 = vpop.f32.mrb[30].mxu0  ;;  %v1028_v1 = vpop.f32.mrb[22].mxu1 }
 0x470   :  { %v1574_v0 = vmul.f32 -1.442695, %v1031_v56  ;;  %v989_v34 = vpop.f32.mrb[31].mxu0  ;;  %v1771_v4 = vpop.f32.mrb[23].mxu1 }
 0x471   :  { %v1575_v15 = vmul.f32 -1.442695, %v1038_v62 }
 0x472   :  { %1962 = vpow2.f32 %v1574_v0 }
 0x473   :  { %1964 = vpow2.f32 %v1575_v15 }
 0x47c   :  { %v1963_v37 = vpop.eup %1962 }
 0x47d   :  { %v1035_v21 = vadd.f32 1.0, %v1963_v37  ;;  %v1965_v3 = vpop.eup %1964 }
 0x47e   :  { %v1042_v12 = vadd.f32 1.0, %v1965_v3 }
 0x47f   :  { %1966 = vrcp.f32 %v1035_v21 }
 0x480   :  { %1968 = vrcp.f32 %v1042_v12 }
 0x489   :  { %v1967_v14 = vpop.eup %1966 }
 0x48a   :  { %v1046_v9 = vmul.f32 %v1967_v14, %v1045_v6  ;;  %v1969_v43 = vpop.eup %1968 }
 0x48b   :  { %v1049_v11 = vsub.f32 1.0, %v1969_v43  ;;  %v1051_v2 = vmul.f32 %v1969_v43, %v2534_v22 }
 0x48c   :  { %v1047_v18 = vadd.f32 %v1046_v9, %v2405_v20 }
 0x48e   :  { %1970 = vtanh.f32 %v1047_v18 }
 0x498   :  { %v1971_v58 = vpop.eup %1970 }
 0x499   :  { %v1050_v51 = vmul.f32 %v1971_v58, %v1049_v11 }
 0x49b   :  { %v2578_v5 = vadd.f32 %v1051_v2, %v1050_v51 }
 0x49d   :  { %v1053_v13 = vpack.c.bf16 %v2578_v5, %v2578_v5 }
 0x49f   :  { %1055 = vst [vmem:[#allocation11 + $0xc] sm:$0xf] %v1053_v13  ;;  %1093 = vmatmul.mubr.bf16.vlgmr.msra.gmra.mrb[32].mxu0 %v1053_v13  ;;  %1789 = vmatmul.mubr.bf16.vlgmr.msra.gmra.mrb[24].mxu1 %v1053_v13  ;;  %v2013_v13 = vld [vmem:[#allocation9] ss:$12 sps:$4 sm:$0xff]  }
 0x4a0   :  { %1171 = vmatpush1.bf16.msra.mxu0 %v2259_v26  ;;  %1793 = vmatpush3.bf16.msra.mxu1 %v2278_v35 }
 0x4a1   :  { %1172 = vmatprep.subr.bf16.mxu0 %v2262_v27  ;;  %1794 = vmatprep.subr.bf16.mxu1 %v2722_v7 }
 0x4a2   :  { %1202 = vmatprep.mubr.bf16.mxu0 %v2723_v17  ;;  %1808 = vmatprep.mubr.msk.bf16.mxu1 %vm2161_vm0, %v2722_v7 }
 0x4a4   :  { %1173 = vmatpush1.bf16.msra.mxu0 %v2265_v29  ;;  %1795 = vmatpush3.bf16.msra.mxu1 %v2288_v39 }
 0x4a5   :  { %1174 = vmatprep.subr.bf16.mxu0 %v2269_v30  ;;  %1796 = vmatprep.subr.bf16.mxu1 %v2722_v7 }
 0x4a8   :  { %1175 = vmatpush1.bf16.msra.mxu0 %v2272_v32  ;;  %1797 = vmatpush3.bf16.msra.mxu1 %v2298_v42 }
 0x4a9   :  { %1176 = vmatprep.subr.bf16.mxu0 %v2275_v33  ;;  %1798 = vmatprep.subr.bf16.mxu1 %v2722_v7 }
 0x4ac   :  { %1177 = vmatpush1.bf16.msra.mxu0 %v2281_v36  ;;  %1799 = vmatpush3.bf16.msra.mxu1 %v2309_v46 }
 0x4ad   :  { %1178 = vmatprep.subr.bf16.mxu0 %v2285_v38  ;;  %1800 = vmatprep.subr.bf16.mxu1 %v2722_v7 }
 0x4b0   :  { %1179 = vmatpush1.bf16.msra.mxu0 %v2292_v40  ;;  %1801 = vmatpush3.bf16.msra.mxu1 %v2321_v49 }
 0x4b1   :  { %1180 = vmatprep.subr.bf16.mxu0 %v2295_v41  ;;  %1802 = vmatprep.subr.bf16.mxu1 %v2722_v7 }
 0x4b4   :  { %1181 = vmatpush1.bf16.msra.mxu0 %v2302_v44  ;;  %1803 = vmatpush3.bf16.msra.mxu1 %v2332_v52 }
 0x4b5   :  { %1182 = vmatprep.subr.bf16.mxu0 %v2306_v45  ;;  %1804 = vmatprep.subr.bf16.mxu1 %v2722_v7 }
 0x4b8   :  { %1183 = vmatpush1.bf16.msra.mxu0 %v2315_v47  ;;  %1805 = vmatpush3.bf16.msra.mxu1 %v2340_v54 }
 0x4b9   :  { %1184 = vmatprep.subr.bf16.mxu0 %v2318_v48  ;;  %1806 = vmatprep.subr.bf16.mxu1 %v2722_v7 }
 0x4bc   :  { %1185 = vmatpush1.bf16.msra.mxu0 %v2325_v50  ;;  %1807 = vmatpush3.bf16.msra.mxu1 %v2347_v55 }
 0x4bd   :  { %1280 = vmatprep.subr.bf16.mxu0 %v2257_v24  ;;  %1812 = vmatprep.subr.bf16.mxu1 %v2722_v7 }
 0x572   :  { %v1094_v20 = vpop.f32.mrb[32].mxu0  ;;  %v1135_v22 = vpop.f32.mrb[24].mxu1 }
 0x573   :  { %v1141_v57 = vadd.f32 %v1094_v20, %v2410_v25  ;;  %v1096_v16 = vpop.f32.mrb[33].mxu0  ;;  %v1790_v10 = vpop.f32.mrb[25].mxu1  ;;  %v1155_v37 = vadd.f32 %v2441_v61, %v1135_v22  ;;  %v2014_v20 = vld [vmem:[#allocation9 + $0x8] ss:$12 sps:$4 sm:$0xff]   ;;  %v2016_v22 = vld [vmem:[#allocation9 + $0x18] ss:$12 sps:$4 sm:$0xff]  }
 0x574   :  { %v1148_v56 = vadd.f32 %v1096_v16, %v2412_v31  ;;  %v1098_v19 = vpop.f32.mrb[34].mxu0  ;;  %v1138_v23 = vpop.f32.mrb[26].mxu1  ;;  %v2018_v16 = vld [vmem:[#allocation9 + $0x34] ss:$12 sps:$4 sm:$0xff]   ;;  %v2019_v10 = vld [vmem:[#allocation9 + $0x30] ss:$12 sps:$4 sm:$0xff]  }
 0x575   :  { %v1576_v62 = vmul.f32 -1.442695, %v1141_v57  ;;  %v1099_v63 = vpop.f32.mrb[35].mxu0  ;;  %v1791_v1 = vpop.f32.mrb[27].mxu1  ;;  %v2017_v57 = vld [vmem:[#allocation9 + $0x20] ss:$12 sps:$4 sm:$0xff]  }
 0x576   :  { %v1577_v0 = vmul.f32 -1.442695, %v1148_v56  ;;  %v2020_v56 = vld [vmem:[#allocation9 + $0x38] ss:$12 sps:$4 sm:$0xff]   ;;  %v2023_v23 = vld [vmem:[#allocation9 + $0x50] ss:$12 sps:$4 sm:$0xff]  }
 0x577   :  { %1972 = vpow2.f32 %v1576_v62  ;;  %v2021_v19 = vld [vmem:[#allocation9 + $0x4c] ss:$12 sps:$4 sm:$0xff]   ;;  %v2024_v62 = vld [vmem:[#allocation9 + $0x64] ss:$12 sps:$4 sm:$0xff]   ;;  %v2026_v1 = vld [vmem:[#allocation9 + $0x68] ss:$12 sps:$4 sm:$0xff]  }
 0x578   :  { %1974 = vpow2.f32 %v1577_v0  ;;  %v2025_v63 = vld [vmem:[#allocation9 + $0x60] ss:$12 sps:$4 sm:$0xff]   ;;  %v2027_v0 = vld [vmem:[#allocation9 + $0x7c] ss:$12 sps:$4 sm:$0xff]  }
 0x581   :  { %v1973_v34 = vpop.eup %1972 }
 0x582   :  { %v1145_v24 = vadd.f32 1.0, %v1973_v34  ;;  %v1975_v4 = vpop.eup %1974  ;;  %v2028_v34 = vld [vmem:[#allocation9 + $0x78] ss:$12 sps:$4 sm:$0xff]  }
 0x583   :  { %v1152_v15 = vadd.f32 1.0, %v1975_v4  ;;  %v2030_v4 = vld [vmem:[#allocation9 + $0x90] ss:$12 sps:$4 sm:$0xff]  }
 0x584   :  { %1976 = vrcp.f32 %v1145_v24  ;;  %v2029_v24 = vld [vmem:[#allocation9 + $0x94] ss:$12 sps:$4 sm:$0xff]  }
 0x585   :  { %1978 = vrcp.f32 %v1152_v15  ;;  %v2031_v15 = vld [vmem:[#allocation9 + $0xac] ss:$12 sps:$4 sm:$0xff]  }
 0x58e   :  { %v1977_v25 = vpop.eup %1976 }
 0x58f   :  { %v1156_v21 = vmul.f32 %v1977_v25, %v1155_v37  ;;  %v1979_v3 = vpop.eup %1978  ;;  %v2032_v37 = vld [vmem:[#allocation9 + $0xa8] ss:$12 sps:$4 sm:$0xff]  }
 0x590   :  { %v1159_v12 = vsub.f32 1.0, %v1979_v3  ;;  %v1161_v9 = vmul.f32 %v1979_v3, %v2578_v5 }
 0x591   :  { %v1157_v31 = vadd.f32 %v1156_v21, %v2422_v60 }
 0x593   :  { %1980 = vtanh.f32 %v1157_v31  ;;  %v2724_v31 = vld [vmem:[#allocation18_spill] sm:$0xff] }
 0x59d   :  { %v1981_v6 = vpop.eup %1980 }
 0x59e   :  { %v1160_v14 = vmul.f32 %v1981_v6, %v1159_v12  ;;  %v2725_v6 = vld [vmem:[#allocation19_spill] sm:$0xff] }
 0x5a0   :  { %v2622_v18 = vadd.f32 %v1161_v9, %v1160_v14 }
 0x5a2   :  { %v1163_v43 = vpack.c.bf16 %v2622_v18, %v2622_v18 }
 0x5a4   :  { %1165 = vst [vmem:[#allocation11 + $0x10] sm:$0xf] %v1163_v43  ;;  %1203 = vmatmul.mubr.bf16.vlgmr.msra.gmra.mrb[36].mxu0 %v1163_v43  ;;  %1809 = vmatmul.mubr.bf16.vlgmr.msra.gmra.mrb[28].mxu1 %v1163_v43 }
 0x5a5   :  { %1281 = vmatpush1.bf16.msra.mxu0 %v2259_v26  ;;  %1813 = vmatpush3.bf16.msra.mxu1 %v2278_v35  ;;  %v2012_v26 = vld [vmem:[#allocation9 + $0x4] ss:$12 sps:$4 sm:$0xff]  }
 0x5a6   :  { %1282 = vmatprep.subr.bf16.mxu0 %v2262_v27  ;;  %1814 = vmatprep.subr.bf16.mxu1 %v2722_v7 }
 0x5a7   :  { %1312 = vmatprep.mubr.bf16.mxu0 %v2723_v17  ;;  %1828 = vmatprep.mubr.msk.bf16.mxu1 %vm2161_vm0, %v2722_v7 }
 0x5a9   :  { %1283 = vmatpush1.bf16.msra.mxu0 %v2265_v29  ;;  %1815 = vmatpush3.bf16.msra.mxu1 %v2288_v39 }
 0x5aa   :  { %1284 = vmatprep.subr.bf16.mxu0 %v2269_v30  ;;  %1816 = vmatprep.subr.bf16.mxu1 %v2722_v7 }
 0x5ad   :  { %1285 = vmatpush1.bf16.msra.mxu0 %v2272_v32  ;;  %1817 = vmatpush3.bf16.msra.mxu1 %v2298_v42 }
 0x5ae   :  { %1286 = vmatprep.subr.bf16.mxu0 %v2275_v33  ;;  %1818 = vmatprep.subr.bf16.mxu1 %v2722_v7 }
 0x5b1   :  { %1287 = vmatpush1.bf16.msra.mxu0 %v2281_v36  ;;  %1819 = vmatpush3.bf16.msra.mxu1 %v2309_v46 }
 0x5b2   :  { %1288 = vmatprep.subr.bf16.mxu0 %v2285_v38  ;;  %1820 = vmatprep.subr.bf16.mxu1 %v2722_v7 }
 0x5b5   :  { %1289 = vmatpush1.bf16.msra.mxu0 %v2292_v40  ;;  %1821 = vmatpush3.bf16.msra.mxu1 %v2321_v49 }
 0x5b6   :  { %1290 = vmatprep.subr.bf16.mxu0 %v2295_v41  ;;  %1822 = vmatprep.subr.bf16.mxu1 %v2722_v7 }
 0x5b9   :  { %1291 = vmatpush1.bf16.msra.mxu0 %v2302_v44  ;;  %1823 = vmatpush3.bf16.msra.mxu1 %v2332_v52 }
 0x5ba   :  { %1292 = vmatprep.subr.bf16.mxu0 %v2306_v45  ;;  %1824 = vmatprep.subr.bf16.mxu1 %v2722_v7 }
 0x5bd   :  { %1293 = vmatpush1.bf16.msra.mxu0 %v2315_v47  ;;  %1825 = vmatpush3.bf16.msra.mxu1 %v2340_v54 }
 0x5be   :  { %1294 = vmatprep.subr.bf16.mxu0 %v2318_v48  ;;  %1826 = vmatprep.subr.bf16.mxu1 %v2722_v7 }
 0x5c1   :  { %1295 = vmatpush1.bf16.msra.mxu0 %v2325_v50  ;;  %1827 = vmatpush3.bf16.msra.mxu1 %v2347_v55 }
 0x5c2   :  { %1390 = vmatprep.subr.bf16.mxu0 %v2012_v26  ;;  %1832 = vmatprep.subr.bf16.mxu1 %v2722_v7 }
 0x677   :  { %v1204_v27 = vpop.f32.mrb[36].mxu0  ;;  %v1245_v29 = vpop.f32.mrb[28].mxu1 }
 0x678   :  { %v1251_v30 = vadd.f32 %v1204_v27, %v2414_v53  ;;  %v1206_v32 = vpop.f32.mrb[37].mxu0  ;;  %v1810_v33 = vpop.f32.mrb[29].mxu1  ;;  %v1265_v48 = vadd.f32 %v2441_v61, %v1245_v29 }
 0x679   :  { %v1258_v35 = vadd.f32 %v1206_v32, %v2419_v59  ;;  %v1208_v36 = vpop.f32.mrb[38].mxu0  ;;  %v1248_v38 = vpop.f32.mrb[30].mxu1 }
 0x67a   :  { %v1578_v39 = vmul.f32 -1.442695, %v1251_v30  ;;  %v1209_v40 = vpop.f32.mrb[39].mxu0  ;;  %v1811_v41 = vpop.f32.mrb[31].mxu1  ;;  %v2726_v36 = vld [vmem:[#allocation16_spill] sm:$0xff] }
 0x67b   :  { %v1579_v42 = vmul.f32 -1.442695, %v1258_v35 }
 0x67c   :  { %1982 = vpow2.f32 %v1578_v39 }
 0x67d   :  { %1984 = vpow2.f32 %v1579_v42 }
 0x686   :  { %v1983_v44 = vpop.eup %1982 }
 0x687   :  { %v1255_v45 = vadd.f32 1.0, %v1983_v44  ;;  %v1985_v46 = vpop.eup %1984 }
 0x688   :  { %v1262_v47 = vadd.f32 1.0, %v1985_v46 }
 0x689   :  { %1986 = vrcp.f32 %v1255_v45 }
 0x68a   :  { %1988 = vrcp.f32 %v1262_v47 }
 0x693   :  { %v1987_v49 = vpop.eup %1986 }
 0x694   :  { %v1266_v50 = vmul.f32 %v1987_v49, %v1265_v48  ;;  %v1989_v59 = vpop.eup %1988  ;;  %v2727_v49 = vld [vmem:[#allocation20_spill] sm:$0xff] }
 0x695   :  { %v1269_v60 = vsub.f32 1.0, %v1989_v59  ;;  %v1271_v51 = vmul.f32 %v1989_v59, %v2622_v18 }
 0x696   :  { %v1267_v53 = vadd.f32 %v1266_v50, %v2428_v8  ;;  %v2015_v8 = vld [vmem:[#allocation9 + $0x1c] ss:$12 sps:$4 sm:$0xff]  }
 0x698   :  { %1990 = vtanh.f32 %v1267_v53 }
 0x6a2   :  { %v1991_v11 = vpop.eup %1990 }
 0x6a3   :  { %v1270_v58 = vmul.f32 %v1991_v11, %v1269_v60 }
 0x6a5   :  { %v2665_v2 = vadd.f32 %v1271_v51, %v1270_v58 }
 0x6a7   :  { %v1273_v5 = vpack.c.bf16 %v2665_v2, %v2665_v2 }
 0x6a9   :  { %1275 = vst [vmem:[#allocation11 + $0x14] sm:$0xf] %v1273_v5  ;;  %1313 = vmatmul.mubr.bf16.vlgmr.msra.gmra.mrb[40].mxu0 %v1273_v5  ;;  %1829 = vmatmul.mubr.bf16.vlgmr.msra.gmra.mrb[32].mxu1 %v1273_v5 }
 0x6aa   :  { %1391 = vmatpush1.bf16.msra.mxu0 %v2013_v13  ;;  %1833 = vmatpush3.bf16.msra.mxu1 %v2014_v20 }
 0x6ab   :  { %1392 = vmatprep.subr.bf16.mxu0 %v2015_v8  ;;  %1834 = vmatprep.subr.bf16.mxu1 %v2722_v7 }
 0x6ac   :  { %1422 = vmatprep.mubr.bf16.mxu0 %v2723_v17  ;;  %1848 = vmatprep.mubr.msk.bf16.mxu1 %vm2161_vm0, %v2722_v7  ;;  %v2022_v17 = vld [vmem:[#allocation9 + $0x48] ss:$12 sps:$4 sm:$0xff]  }
 0x6ae   :  { %1393 = vmatpush1.bf16.msra.mxu0 %v2016_v22  ;;  %1835 = vmatpush3.bf16.msra.mxu1 %v2017_v57 }
 0x6af   :  { %1394 = vmatprep.subr.bf16.mxu0 %v2018_v16  ;;  %1836 = vmatprep.subr.bf16.mxu1 %v2722_v7 }
 0x6b2   :  { %1395 = vmatpush1.bf16.msra.mxu0 %v2019_v10  ;;  %1837 = vmatpush3.bf16.msra.mxu1 %v2020_v56 }
 0x6b3   :  { %1396 = vmatprep.subr.bf16.mxu0 %v2021_v19  ;;  %1838 = vmatprep.subr.bf16.mxu1 %v2722_v7  ;;  %v2728_v19 = vld [vmem:[#allocation17_spill] sm:$0xff] }
 0x6b6   :  { %1397 = vmatpush1.bf16.msra.mxu0 %v2022_v17  ;;  %1839 = vmatpush3.bf16.msra.mxu1 %v2023_v23 }
 0x6b7   :  { %1398 = vmatprep.subr.bf16.mxu0 %v2024_v62  ;;  %1840 = vmatprep.subr.bf16.mxu1 %v2722_v7 }
 0x6ba   :  { %1399 = vmatpush1.bf16.msra.mxu0 %v2025_v63  ;;  %1841 = vmatpush3.bf16.msra.mxu1 %v2026_v1 }
 0x6bb   :  { %1400 = vmatprep.subr.bf16.mxu0 %v2027_v0  ;;  %1842 = vmatprep.subr.bf16.mxu1 %v2722_v7 }
 0x6be   :  { %1401 = vmatpush1.bf16.msra.mxu0 %v2028_v34  ;;  %1843 = vmatpush3.bf16.msra.mxu1 %v2332_v52 }
 0x6bf   :  { %1402 = vmatprep.subr.bf16.mxu0 %v2029_v24  ;;  %1844 = vmatprep.subr.bf16.mxu1 %v2722_v7 }
 0x6c2   :  { %1403 = vmatpush1.bf16.msra.mxu0 %v2030_v4  ;;  %1845 = vmatpush3.bf16.msra.mxu1 %v2340_v54 }
 0x6c3   :  { %1404 = vmatprep.subr.bf16.mxu0 %v2031_v15  ;;  %1846 = vmatprep.subr.bf16.mxu1 %v2722_v7 }
 0x6c6   :  { %1405 = vmatpush1.bf16.msra.mxu0 %v2032_v37  ;;  %1847 = vmatpush3.bf16.msra.mxu1 %v2347_v55 }
 0x77c   :  { %v1314_v25 = vpop.f32.mrb[40].mxu0  ;;  %v1355_v21 = vpop.f32.mrb[32].mxu1 }
 0x77d   :  { %v1361_v52 = vadd.f32 %v1314_v25, %v2724_v31  ;;  %v1316_v3 = vpop.f32.mrb[41].mxu0  ;;  %v1830_v12 = vpop.f32.mrb[33].mxu1  ;;  %v1375_v32 = vadd.f32 %v2441_v61, %v1355_v21 }
 0x77e   :  { %v1368_v14 = vadd.f32 %v1316_v3, %v2725_v6  ;;  %v1318_v9 = vpop.f32.mrb[42].mxu0  ;;  %v1358_v18 = vpop.f32.mrb[34].mxu1 }
 0x77f   :  { %v1580_v43 = vmul.f32 -1.442695, %v1361_v52  ;;  %v1319_v54 = vpop.f32.mrb[43].mxu0  ;;  %v1831_v26 = vpop.f32.mrb[35].mxu1 }
 0x780   :  { %v1581_v27 = vmul.f32 -1.442695, %v1368_v14 }
 0x781   :  { %1992 = vpow2.f32 %v1580_v43 }
 0x782   :  { %1994 = vpow2.f32 %v1581_v27 }
 0x78b   :  { %v1993_v7 = vpop.eup %1992 }
 0x78c   :  { %v1365_v29 = vadd.f32 1.0, %v1993_v7  ;;  %v1995_v55 = vpop.eup %1994 }
 0x78d   :  { %v1372_v30 = vadd.f32 1.0, %v1995_v55 }
 0x78e   :  { %1996 = vrcp.f32 %v1365_v29 }
 0x78f   :  { %1998 = vrcp.f32 %v1372_v30 }
 0x798   :  { %v1997_v33 = vpop.eup %1996 }
 0x799   :  { %v1376_v35 = vmul.f32 %v1997_v33, %v1375_v32  ;;  %v1999_v39 = vpop.eup %1998 }
 0x79a   :  { %v1379_v40 = vsub.f32 1.0, %v1999_v39  ;;  %v1381_v44 = vmul.f32 %v1999_v39, %v2665_v2 }
 0x79b   :  { %v1377_v38 = vadd.f32 %v1376_v35, %v2726_v36 }
 0x79d   :  { %2000 = vtanh.f32 %v1377_v38 }
 0x7a7   :  { %v2001_v41 = vpop.eup %2000 }
 0x7a8   :  { %v1380_v42 = vmul.f32 %v2001_v41, %v1379_v40 }
 0x7aa   :  { %v1382_v45 = vadd.f32 %v1381_v44, %v1380_v42 }
 0x7ac   :  { %v1383_v46 = vpack.c.bf16 %v1382_v45, %v1382_v45 }
 0x7ae   :  { %1385 = vst [vmem:[#allocation11 + $0x18] sm:$0xf] %v1383_v46  ;;  %1423 = vmatmul.mubr.bf16.vlgmr.msra.gmra.mrb[44].mxu0 %v1383_v46  ;;  %1849 = vmatmul.mubr.bf16.vlgmr.msra.gmra.mrb[36].mxu1 %v1383_v46 }
 0x881   :  { %v1424_v47 = vpop.f32.mrb[44].mxu0  ;;  %v1465_v48 = vpop.f32.mrb[36].mxu1 }
 0x882   :  { %v1471_v50 = vadd.f32 %v1424_v47, %v2727_v49  ;;  %v1426_v53 = vpop.f32.mrb[45].mxu0  ;;  %v1850_v59 = vpop.f32.mrb[37].mxu1  ;;  %v1485_v16 = vadd.f32 %v2441_v61, %v1465_v48 }
 0x883   :  { %v1478_v60 = vadd.f32 %v1426_v53, %v2436_v28  ;;  %v1428_v11 = vpop.f32.mrb[46].mxu0  ;;  %v1468_v58 = vpop.f32.mrb[38].mxu1 }
 0x884   :  { %v1582_v51 = vmul.f32 -1.442695, %v1471_v50  ;;  %v1429_v5 = vpop.f32.mrb[47].mxu0  ;;  %v1851_v13 = vpop.f32.mrb[39].mxu1 }
 0x885   :  { %v1583_v2 = vmul.f32 -1.442695, %v1478_v60 }
 0x886   :  { %2002 = vpow2.f32 %v1582_v51 }
 0x887   :  { %2004 = vpow2.f32 %v1583_v2 }
 0x890   :  { %v2003_v20 = vpop.eup %2002 }
 0x891   :  { %v1475_v8 = vadd.f32 1.0, %v2003_v20  ;;  %v2005_v22 = vpop.eup %2004 }
 0x892   :  { %v1482_v57 = vadd.f32 1.0, %v2005_v22 }
 0x893   :  { %2006 = vrcp.f32 %v1475_v8 }
 0x894   :  { %2008 = vrcp.f32 %v1482_v57 }
 0x89d   :  { %v2007_v10 = vpop.eup %2006 }
 0x89e   :  { %v1486_v56 = vmul.f32 %v2007_v10, %v1485_v16  ;;  %v2009_v17 = vpop.eup %2008 }
 0x89f   :  { %v1489_v23 = vsub.f32 1.0, %v2009_v17  ;;  %v1491_v1 = vmul.f32 %v2009_v17, %v1382_v45 }
 0x8a0   :  { %v1487_v28 = vadd.f32 %v1486_v56, %v2728_v19 }
 0x8a2   :  { %2010 = vtanh.f32 %v1487_v28 }
 0x8ac   :  { %v2011_v62 = vpop.eup %2010 }
 0x8ad   :  { %v1490_v63 = vmul.f32 %v2011_v62, %v1489_v23 }
 0x8af   :  { %v1492_v0 = vadd.f32 %v1491_v1, %v1490_v63 }
 0x8b1   :  { %v1493_v34 = vpack.c.bf16 %v1492_v0, %v1492_v0 }
 0x8b3   :  { %1495 = vst [vmem:[#allocation11 + $0x1c] sm:$0xf] %v1493_v34 }
 0x8b4   :  { %2132 = shalt.err (!%p2129_p8)
}
 0x8b5   :  { %s2133_s30 = scalar_lea.hbm %s2712_s6, 512 }
 0x8b6   :  { %p2134_p9 = scmp.ne.s32.totalorder %s2712_s6, %s2133_s30  ;;  %p2137_p10 = scmp.lt.u32.totalorder %s2133_s30, %s2712_s6 }
 0x8b8   :  { %p2139_p11 = pnand %p2137_p10, %p2134_p9 }
 0x8ba   :  { %2142 = shalt.err (!%p2139_p11)
}
 0x8bb   :  { %1507 = dma.vmem_to_hbm [thread:$0]  %s1502_s26, 512, %s2712_s6, [#allocation5], %s2153_s1, %s2153_s1, %s2154_s19  }
 0x8bc   :  { %2149 = dma.done.wait [#allocation5], 512  }
 0x8bd   :  { %2150 = vsyncadd [#allocation5], 4294966784 }
 0x8be   :  { %1511 = vsyncpa [#allocation4], 1 }
 0x8bf   :  { %1512 = vsyncpa [#allocation7], 1 }
 0x8c0   :  { %1513 = vsyncpa [#allocation10], 1 }
 0x8c1   :  { %1514 = vsyncpa [#allocation5], 1 }

</bundles_post_ra>
